<compile_context>
chip_gen: v7x
topology: tpu7x:2x2x1
jax: 0.10.0
libtpu: 0.0.40
codegen_flags: <defaults>
</compile_context>

<pallas_src>
import functools

import jax
import jax.numpy as jnp
from jax import lax
from jax.experimental import pallas as pl
from jax.experimental.pallas import tpu as pltpu


def _round_up(x, m):
    return (x + m - 1) // m * m


def _m_tiling(m, *, target=512, align=16, split_threshold=256):
    """Row tiling -> (tile, padded_extent, grid).

    Tiles are multiples of `align` (16 keeps bf16 sublane tiles aligned so the
    in-kernel parity-merge reshape is free).  Small extents use a single block
    (no blind padding to 256); once there is real work we split >=2 ways so a
    v7x megacore can shard the "parallel" grid axis.  Waste < align*grid rows.
    """
    grid = max(1, -(-m // target))
    if grid == 1 and m >= split_threshold:
        grid = 2
    tm = _round_up(-(-m // grid), align)
    return tm, tm * grid, grid


# ----------------------------- Pallas kernels ------------------------------

def _conv_pool_kernel(p_ref, w_ref, b_ref, o_ref):
    """Fused conv(as matmul) + bias + ReLU + 2x2 maxpool, bf16 output.

    p_ref: (4, TM, Kp) bf16  im2col patches, one slab per 2x2-pool parity
    w_ref: (Kp, Np)    bf16  flattened conv weights (zero-padded)
    b_ref: (1, Np)     f32   bias (zero-padded)
    o_ref: (TM, Np)    bf16  pooled activations (Np = 128, lane-dense)

    max-over-parity happens BEFORE bias/ReLU; this equals pool(relu(conv + b))
    only because the bias is parity-constant and ReLU is monotone.
    """
    _, tm, kp = p_ref.shape
    n = w_ref.shape[1]
    # One long MXU matmul (v6e/v7x 256-wide MXU stays full, single result-FIFO
    # drain).  TM is a multiple of 16, so the reshape is a layout no-op.
    acc = jnp.dot(p_ref[...].reshape(4 * tm, kp), w_ref[...],
                  preferred_element_type=jnp.float32)
    pooled = jnp.max(acc.reshape(4, tm, n), axis=0)
    o_ref[...] = jnp.maximum(pooled + b_ref[...], 0.0).astype(o_ref.dtype)


def _mlp_kernel(x_ref, w1_ref, b1_ref, w2_ref, b2_ref, w3_ref, b3_ref, o_ref):
    """Fused fc1+ReLU -> fc2+ReLU -> fc_final; intermediates stay in VMEM."""
    h = jnp.dot(x_ref[...], w1_ref[...], preferred_element_type=jnp.float32)
    h = jnp.maximum(h + b1_ref[...], 0.0)
    h = jnp.dot(h.astype(jnp.bfloat16), w2_ref[...],
                preferred_element_type=jnp.float32)
    h = jnp.maximum(h + b2_ref[...], 0.0)
    h = jnp.dot(h.astype(jnp.bfloat16), w3_ref[...],
                preferred_element_type=jnp.float32)
    o_ref[...] = h + b3_ref[...]


# --------------------- one-time parameter preparation -----------------------

def _patch_order(c, kh, kw):
    """Permutation: patch-feature slot j -> (h, w, c)-flattened input offset.

    Derived with an exact integer probe through conv_general_dilated_patches,
    so the weight fold never depends on its internal ordering convention.
    """
    probe = jnp.arange(kh * kw * c, dtype=jnp.float32).reshape(1, kh, kw, c)
    flat = lax.conv_general_dilated_patches(
        probe, (kh, kw), (1, 1), 'VALID',
        dimension_numbers=('NHWC', 'HWIO', 'NHWC'))
    return flat.reshape(kh * kw * c).astype(jnp.int32)


def _prep_conv(w_oihw, bias):
    o, c, kh, kw = w_oihw.shape
    k = c * kh * kw
    kp, npad = _round_up(k, 128), _round_up(o, 128)
    w_hwc = jnp.transpose(w_oihw, (2, 3, 1, 0)).reshape(k, o)   # rows in (h,w,c)
    wf = jnp.take(w_hwc, _patch_order(c, kh, kw), axis=0)       # rows in patch order
    wf = jnp.pad(wf, ((0, kp - k), (0, npad - o))).astype(jnp.bfloat16)
    bp = jnp.pad(bias, (0, npad - o)).reshape(1, npad).astype(jnp.float32)
    return wf, bp


def _prep_fc(w, b):
    k, n = w.shape
    kp, npad = _round_up(k, 128), _round_up(n, 128)
    wp = jnp.pad(w, ((0, kp - k), (0, npad - n))).astype(jnp.bfloat16)
    bp = jnp.pad(b, (0, npad - n)).reshape(1, npad).astype(jnp.float32)
    return wp, bp


def prepare_params(params, img_hw=(32, 32)):
    """One-time weight prep (hoisted out of the per-forward graph)."""
    (w1, b1, w2, b2, wf1, bf1, wf2, bf2, wfo, bfo) = params
    kh, kw = w1.shape[2], w1.shape[3]
    c1, c2 = w1.shape[0], w2.shape[0]
    s1h, s1w = (img_hw[0] - kh + 1) // 2, (img_hw[1] - kw + 1) // 2   # 14, 14
    s2h, s2w = (s1h - kh + 1) // 2, (s1w - kw + 1) // 2               # 5, 5

    c1wp, c1bp = _prep_conv(w1, b1)
    c2wp, c2bp = _prep_conv(w2, b2)

    # Fold torch's NCHW .view(-1, 16*5*5) flatten order (c, h, w) into fc1's
    # rows so it consumes the kernels' (h, w, c)-ordered flatten directly.
    n1 = wf1.shape[1]
    wf1_folded = (wf1.reshape(c2, s2h, s2w, n1)
                     .transpose(1, 2, 0, 3)
                     .reshape(c2 * s2h * s2w, n1))                    # K = 400
    f1w, f1b = _prep_fc(wf1_folded, bf1)                              # 512 x 128
    f2w, f2b = _prep_fc(wf2, bf2)
    f3w, f3b = _prep_fc(wfo, bfo)

    prepped = (c1wp, c1bp, c2wp, c2bp, f1w, f1b, f2w, f2b, f3w, f3b)
    meta = (c1, c2, kh, kw, wfo.shape[1])        # static python ints
    return prepped, meta


# ------------------------------ kernel wrappers -----------------------------

def conv_relu_pool(x_nhwc, w_padded, b_padded, *, kh, kw):
    """VALID kxk conv (stride 1) + bias + ReLU + MaxPool2d(2,2), fused.

    x_nhwc: [B, H, W, C] bf16.  Returns ([Mp, 128] bf16, (Ho, Wo, M)); rows
    ordered (b, ho, wo); first Cout lanes real, remaining lanes exact zeros.
    """
    B, H, W, C = x_nhwc.shape
    OH, OW = H - kh + 1, W - kw + 1
    Ho, Wo = OH // 2, OW // 2
    K = kh * kw * C
    Kp, Np = w_padded.shape
    M = B * Ho * Wo

    # im2col in ONE XLA op (bf16 copies are exact), then regroup by 2x2-pool
    # parity with a reshape/transpose: patches[p, (b, r, c), k].
    patches = lax.conv_general_dilated_patches(
        x_nhwc, (kh, kw), (1, 1), 'VALID',
        dimension_numbers=('NHWC', 'HWIO', 'NHWC'))        # [B, OH, OW, K]
    patches = (patches.reshape(B, Ho, 2, Wo, 2, K)
                      .transpose(2, 4, 0, 1, 3, 5)
                      .reshape(4, M, K))

    tm, Mp, grid = _m_tiling(M)
    patches = jnp.pad(patches, ((0, 0), (0, Mp - M), (0, Kp - K)))

    out = pl.pallas_call(
        _conv_pool_kernel,
        out_shape=jax.ShapeDtypeStruct((Mp, Np), jnp.bfloat16),
        grid_spec=pltpu.PrefetchScalarGridSpec(
            num_scalar_prefetch=0,
            grid=(grid,),
            in_specs=[
                pl.BlockSpec((4, tm, Kp), lambda i: (0, i, 0)),
                pl.BlockSpec((Kp, Np), lambda i: (0, 0)),
                pl.BlockSpec((1, Np), lambda i: (0, 0)),
            ],
            out_specs=pl.BlockSpec((tm, Np), lambda i: (i, 0)),
        ),
        compiler_params=pltpu.CompilerParams(
            dimension_semantics=("parallel",)),
    )(patches, w_padded, b_padded)
    return out, (Ho, Wo, M)


def mlp_head(x_bf16, w1, b1, w2, b2, w3, b3):
    """x: [B, K] bf16; weights pre-padded bf16 (K->512, N->128). -> [B,128] f32."""
    B, K = x_bf16.shape
    Kp = w1.shape[0]
    n1, n2, n3 = w1.shape[1], w2.shape[1], w3.shape[1]
    tb, Bp, grid = _m_tiling(B)
    x = jnp.pad(x_bf16, ((0, Bp - B), (0, Kp - K)))

    out = pl.pallas_call(
        _mlp_kernel,
        out_shape=jax.ShapeDtypeStruct((Bp, n3), jnp.float32),
        grid_spec=pltpu.PrefetchScalarGridSpec(
            num_scalar_prefetch=0,
            grid=(grid,),
            in_specs=[
                pl.BlockSpec((tb, Kp), lambda i: (i, 0)),
                pl.BlockSpec((Kp, n1), lambda i: (0, 0)),
                pl.BlockSpec((1, n1), lambda i: (0, 0)),
                pl.BlockSpec((n1, n2), lambda i: (0, 0)),
                pl.BlockSpec((1, n2), lambda i: (0, 0)),
                pl.BlockSpec((n2, n3), lambda i: (0, 0)),
                pl.BlockSpec((1, n3), lambda i: (0, 0)),
            ],
            out_specs=pl.BlockSpec((tb, n3), lambda i: (i, 0)),
        ),
        compiler_params=pltpu.CompilerParams(
            dimension_semantics=("parallel",)),
    )(x, w1, b1, w2, b2, w3, b3)
    return out[:B]


# ------------------------------- forward pass --------------------------------

def net_forward(x_nchw, prepped, meta):
    """Reproduces Net.forward (CIFAR10 branch, hidden_layers=2)."""
    c1w, c1b, c2w, c2b, f1w, f1b, f2w, f2b, f3w, f3b = prepped
    c1, c2, kh, kw, n_out = meta
    B = x_nchw.shape[0]

    x = jnp.transpose(x_nchw, (0, 2, 3, 1)).astype(jnp.bfloat16)    # NHWC bf16

    h1, (H1, W1, M1) = conv_relu_pool(x, c1w, c1b, kh=kh, kw=kw)
    h1 = h1[:M1].reshape(B, H1, W1, h1.shape[-1])[..., :c1]         # [B,14,14,6]

    h2, (H2, W2, M2) = conv_relu_pool(h1, c2w, c2b, kh=kh, kw=kw)
    h2 = h2[:M2].reshape(B, H2, W2, h2.shape[-1])[..., :c2]         # [B,5,5,16]
    # (h, w, c)-ordered flatten; fc1 was folded to this order at prep time,
    # so fc1's K is 400->512 instead of 25*128.
    xfc = h2.reshape(B, H2 * W2 * c2)                               # [B, 400] bf16

    logits = mlp_head(xfc, f1w, f1b, f2w, f2b, f3w, f3b)            # [B, 128] f32
    return logits[:, :n_out]                                        # [B, 10]


# ------------------------- pure-JAX reference check --------------------------
# Matches the kernel's numerics: bf16 matmul/conv inputs, f32 accumulation.

def ref_forward(x_nchw, params):
    (w1, b1, w2, b2, wf1, bf1, wf2, bf2, wfo, bfo) = params
    dn = ('NCHW', 'OIHW', 'NCHW')
    bf = jnp.bfloat16

    def conv(x, w, b):
        y = lax.conv_general_dilated(
            x.astype(bf), w.astype(bf), (1, 1), 'VALID',
            dimension_numbers=dn, preferred_element_type=jnp.float32)
        return jnp.maximum(y + b.reshape(1, -1, 1, 1), 0.0)

    def pool(x):
        return lax.reduce_window(x, -jnp.inf, lax.max,
                                 (1, 1, 2, 2), (1, 1, 2, 2), 'VALID')

    def fc(x, w, b):
        return jnp.dot(x.astype(bf), w.astype(bf),
                       preferred_element_type=jnp.float32) + b

    h = pool(conv(x_nchw, w1, b1))
    h = pool(conv(h, w2, b2))
    h = h.reshape(h.shape[0], -1)                  # torch .view order (c, h, w)
    h = jnp.maximum(fc(h, wf1, bf1), 0.0)
    h = jnp.maximum(fc(h, wf2, bf2), 0.0)
    return fc(h, wfo, bfo)


# ---------------------------------- main -------------------------------------

def init_params(key):
    ks = jax.random.split(key, 10)
    s = 0.1
    w1 = jax.random.normal(ks[0], (6, 3, 5, 5), jnp.float32) * s
    b1 = jax.random.normal(ks[1], (6,), jnp.float32) * s
    w2 = jax.random.normal(ks[2], (16, 6, 5, 5), jnp.float32) * s
    b2 = jax.random.normal(ks[3], (16,), jnp.float32) * s
    wf1 = jax.random.normal(ks[4], (400, 120), jnp.float32) * s
    bf1 = jax.random.normal(ks[5], (120,), jnp.float32) * s
    wf2 = jax.random.normal(ks[6], (120, 84), jnp.float32) * s
    bf2 = jax.random.normal(ks[7], (84,), jnp.float32) * s
    wfo = jax.random.normal(ks[8], (84, 10), jnp.float32) * s
    bfo = jax.random.normal(ks[9], (10,), jnp.float32) * s
    return (w1, b1, w2, b2, wf1, bf1, wf2, bf2, wfo, bfo)


if __name__ == "__main__":
    key = jax.random.PRNGKey(0)
    kx, kp = jax.random.split(key)
    x = jax.random.normal(kx, (2, 3, 32, 32), jnp.float32)   # CIFAR10-shaped NCHW
    params = init_params(kp)

    # One-time weight prep (outside the jitted forward).
    prepped, meta = prepare_params(params, img_hw=(32, 32))
    fwd = jax.jit(functools.partial(net_forward, meta=meta))

    out = jax.block_until_ready(fwd(x, prepped))
    assert out.shape == (2, 10), out.shape

    ref = jax.block_until_ready(jax.jit(ref_forward)(x, params))
    err = float(jnp.max(jnp.abs(out - ref)))
    # Both paths use bf16 operands with f32 accumulation; residual is f32
    # accumulation-order noise plus rare 1-ulp bf16 requantization flips.
    assert err < 2e-2, err

    print("KERNEL_OK")
</pallas_src>

<mosaic_0001>
module attributes {stable_mosaic.version = 11 : i64} {
  func.func @_conv_pool_kernel(%arg0: i32, %arg1: memref<4x208x128xbf16, #tpu.memory_space<vmem>>, %arg2: memref<128x128xbf16, #tpu.memory_space<vmem>>, %arg3: memref<1x128xf32, #tpu.memory_space<vmem>>, %arg4: memref<208x128xbf16, #tpu.memory_space<vmem>>) attributes {dimension_semantics = [#tpu.dimension_semantics<parallel>], iteration_bounds = array<i64: 2>, scalar_prefetch = 0 : i64, scratch_operands = 0 : i64, tpu.core_type = #tpu.core_type<tc>, window_params = [{transform_indices = @transform_0, window_bounds = array<i64: 4, 208, 128>}, {pipeline_mode = #tpu.pipeline_mode<synchronous>, transform_indices = @transform_1, window_bounds = array<i64: 128, 128>}, {pipeline_mode = #tpu.pipeline_mode<synchronous>, transform_indices = @transform_2, window_bounds = array<i64: 1, 128>}, {transform_indices = @transform_3, window_bounds = array<i64: 208, 128>}]} {
    %c0 = arith.constant 0 : index
    %c0_0 = arith.constant 0 : index
    %c0_1 = arith.constant 0 : index
    %0 = vector.load %arg1[%c0, %c0_0, %c0_1] : memref<4x208x128xbf16, #tpu.memory_space<vmem>>, vector<4x208x128xbf16>
    %1 = vector.shape_cast %0 : vector<4x208x128xbf16> to vector<832x128xbf16>
    %c0_2 = arith.constant 0 : index
    %c0_3 = arith.constant 0 : index
    %2 = vector.load %arg2[%c0_2, %c0_3] : memref<128x128xbf16, #tpu.memory_space<vmem>>, vector<128x128xbf16>
    %cst = arith.constant dense<0.000000e+00> : vector<832x128xf32>
    %3 = tpu.matmul %1, %2, %cst {dimension_numbers = #tpu.dot_dimension_numbers<[1], [0], [0], [1], [0, 0, 1, 1], [], []>} : vector<832x128xbf16>, vector<128x128xbf16>, vector<832x128xf32> -> vector<832x128xf32>
    %4 = vector.shape_cast %3 : vector<832x128xf32> to vector<4x208x128xf32>
    %cst_4 = arith.constant dense<0xFF800000> : vector<208x128xf32>
    %5 = vector.multi_reduction <maximumf>, %4, %cst_4 [0] : vector<4x208x128xf32> to vector<208x128xf32>
    %c0_5 = arith.constant 0 : index
    %c0_6 = arith.constant 0 : index
    %6 = vector.load %arg3[%c0_5, %c0_6] : memref<1x128xf32, #tpu.memory_space<vmem>>, vector<1x128xf32>
    %7 = vector.broadcast %6 : vector<1x128xf32> to vector<208x128xf32>
    %8 = arith.addf %5, %7 : vector<208x128xf32>
    %cst_7 = arith.constant 0.000000e+00 : f32
    %9 = vector.broadcast %cst_7 : f32 to vector<208x128xf32>
    %10 = arith.maximumf %8, %9 : vector<208x128xf32>
    %11 = arith.truncf %10 : vector<208x128xf32> to vector<208x128xbf16>
    %c0_8 = arith.constant 0 : index
    %c0_9 = arith.constant 0 : index
    %12 = vector.load %arg4[%c0_8, %c0_9] : memref<208x128xbf16, #tpu.memory_space<vmem>>, vector<208x128xbf16>
    tpu.vector_store %arg4[%c0_8, %c0_9], %11 {strides = array<i32>} : memref<208x128xbf16, #tpu.memory_space<vmem>>, vector<208x128xbf16>,
    return
  }
  func.func @transform_0(%arg0: i32) -> (i32, i32, i32) {
    %c0_i32 = arith.constant 0 : i32
    %c0_i32_0 = arith.constant 0 : i32
    %c0_i32_1 = arith.constant 0 : i32
    return %c0_i32, %arg0, %c0_i32_0 : i32, i32, i32
  }
  func.func @transform_1(%arg0: i32) -> (i32, i32) {
    %c0_i32 = arith.constant 0 : i32
    %c0_i32_0 = arith.constant 0 : i32
    %c0_i32_1 = arith.constant 0 : i32
    return %c0_i32, %c0_i32_0 : i32, i32
  }
  func.func @transform_2(%arg0: i32) -> (i32, i32) {
    %c0_i32 = arith.constant 0 : i32
    %c0_i32_0 = arith.constant 0 : i32
    %c0_i32_1 = arith.constant 0 : i32
    return %c0_i32, %c0_i32_0 : i32, i32
  }
  func.func @transform_3(%arg0: i32) -> (i32, i32) {
    %c0_i32 = arith.constant 0 : i32
    %c0_i32_0 = arith.constant 0 : i32
    return %arg0, %c0_i32 : i32, i32
  }
}

module attributes {stable_mosaic.version = 11 : i64} {
  func.func @_conv_pool_kernel(%arg0: i32, %arg1: memref<4x64x256xbf16, #tpu.memory_space<vmem>>, %arg2: memref<256x128xbf16, #tpu.memory_space<vmem>>, %arg3: memref<1x128xf32, #tpu.memory_space<vmem>>, %arg4: memref<64x128xbf16, #tpu.memory_space<vmem>>) attributes {dimension_semantics = [#tpu.dimension_semantics<parallel>], iteration_bounds = array<i64: 1>, scalar_prefetch = 0 : i64, scratch_operands = 0 : i64, tpu.core_type = #tpu.core_type<tc>, window_params = [{transform_indices = @transform_0, window_bounds = array<i64: 4, 64, 256>}, {pipeline_mode = #tpu.pipeline_mode<synchronous>, transform_indices = @transform_1, window_bounds = array<i64: 256, 128>}, {pipeline_mode = #tpu.pipeline_mode<synchronous>, transform_indices = @transform_2, window_bounds = array<i64: 1, 128>}, {transform_indices = @transform_3, window_bounds = array<i64: 64, 128>}]} {
    %c0 = arith.constant 0 : index
    %c0_0 = arith.constant 0 : index
    %c0_1 = arith.constant 0 : index
    %0 = vector.load %arg1[%c0, %c0_0, %c0_1] : memref<4x64x256xbf16, #tpu.memory_space<vmem>>, vector<4x64x256xbf16>
    %1 = vector.shape_cast %0 : vector<4x64x256xbf16> to vector<256x256xbf16>
    %c0_2 = arith.constant 0 : index
    %c0_3 = arith.constant 0 : index
    %2 = vector.load %arg2[%c0_2, %c0_3] : memref<256x128xbf16, #tpu.memory_space<vmem>>, vector<256x128xbf16>
    %cst = arith.constant dense<0.000000e+00> : vector<256x128xf32>
    %3 = tpu.matmul %1, %2, %cst {dimension_numbers = #tpu.dot_dimension_numbers<[1], [0], [0], [1], [0, 0, 1, 1], [], []>} : vector<256x256xbf16>, vector<256x128xbf16>, vector<256x128xf32> -> vector<256x128xf32>
    %4 = vector.shape_cast %3 : vector<256x128xf32> to vector<4x64x128xf32>
    %cst_4 = arith.constant dense<0xFF800000> : vector<64x128xf32>
    %5 = vector.multi_reduction <maximumf>, %4, %cst_4 [0] : vector<4x64x128xf32> to vector<64x128xf32>
    %c0_5 = arith.constant 0 : index
    %c0_6 = arith.constant 0 : index
    %6 = vector.load %arg3[%c0_5, %c0_6] : memref<1x128xf32, #tpu.memory_space<vmem>>, vector<1x128xf32>
    %7 = vector.broadcast %6 : vector<1x128xf32> to vector<64x128xf32>
    %8 = arith.addf %5, %7 : vector<64x128xf32>
    %cst_7 = arith.constant 0.000000e+00 : f32
    %9 = vector.broadcast %cst_7 : f32 to vector<64x128xf32>
    %10 = arith.maximumf %8, %9 : vector<64x128xf32>
    %11 = arith.truncf %10 : vector<64x128xf32> to vector<64x128xbf16>
    %c0_8 = arith.constant 0 : index
    %c0_9 = arith.constant 0 : index
    %12 = vector.load %arg4[%c0_8, %c0_9] : memref<64x128xbf16, #tpu.memory_space<vmem>>, vector<64x128xbf16>
    tpu.vector_store %arg4[%c0_8, %c0_9], %11 {strides = array<i32>} : memref<64x128xbf16, #tpu.memory_space<vmem>>, vector<64x128xbf16>,
    return
  }
  func.func @transform_0(%arg0: i32) -> (i32, i32, i32) {
    %c0_i32 = arith.constant 0 : i32
    %c0_i32_0 = arith.constant 0 : i32
    %c0_i32_1 = arith.constant 0 : i32
    return %c0_i32, %arg0, %c0_i32_0 : i32, i32, i32
  }
  func.func @transform_1(%arg0: i32) -> (i32, i32) {
    %c0_i32 = arith.constant 0 : i32
    %c0_i32_0 = arith.constant 0 : i32
    %c0_i32_1 = arith.constant 0 : i32
    return %c0_i32, %c0_i32_0 : i32, i32
  }
  func.func @transform_2(%arg0: i32) -> (i32, i32) {
    %c0_i32 = arith.constant 0 : i32
    %c0_i32_0 = arith.constant 0 : i32
    %c0_i32_1 = arith.constant 0 : i32
    return %c0_i32, %c0_i32_0 : i32, i32
  }
  func.func @transform_3(%arg0: i32) -> (i32, i32) {
    %c0_i32 = arith.constant 0 : i32
    %c0_i32_0 = arith.constant 0 : i32
    return %arg0, %c0_i32 : i32, i32
  }
}

module attributes {stable_mosaic.version = 11 : i64} {
  func.func @_mlp_kernel(%arg0: i32, %arg1: memref<16x512xbf16, #tpu.memory_space<vmem>>, %arg2: memref<512x128xbf16, #tpu.memory_space<vmem>>, %arg3: memref<1x128xf32, #tpu.memory_space<vmem>>, %arg4: memref<128x128xbf16, #tpu.memory_space<vmem>>, %arg5: memref<1x128xf32, #tpu.memory_space<vmem>>, %arg6: memref<128x128xbf16, #tpu.memory_space<vmem>>, %arg7: memref<1x128xf32, #tpu.memory_space<vmem>>, %arg8: memref<16x128xf32, #tpu.memory_space<vmem>>) attributes {dimension_semantics = [#tpu.dimension_semantics<parallel>], iteration_bounds = array<i64: 1>, scalar_prefetch = 0 : i64, scratch_operands = 0 : i64, tpu.core_type = #tpu.core_type<tc>, window_params = [{transform_indices = @transform_0, window_bounds = array<i64: 16, 512>}, {pipeline_mode = #tpu.pipeline_mode<synchronous>, transform_indices = @transform_1, window_bounds = array<i64: 512, 128>}, {pipeline_mode = #tpu.pipeline_mode<synchronous>, transform_indices = @transform_2, window_bounds = array<i64: 1, 128>}, {pipeline_mode = #tpu.pipeline_mode<synchronous>, transform_indices = @transform_3, window_bounds = array<i64: 128, 128>}, {pipeline_mode = #tpu.pipeline_mode<synchronous>, transform_indices = @transform_4, window_bounds = array<i64: 1, 128>}, {pipeline_mode = #tpu.pipeline_mode<synchronous>, transform_indices = @transform_5, window_bounds = array<i64: 128, 128>}, {pipeline_mode = #tpu.pipeline_mode<synchronous>, transform_indices = @transform_6, window_bounds = array<i64: 1, 128>}, {transform_indices = @transform_7, window_bounds = array<i64: 16, 128>}]} {
    %c0 = arith.constant 0 : index
    %c0_0 = arith.constant 0 : index
    %0 = vector.load %arg1[%c0, %c0_0] : memref<16x512xbf16, #tpu.memory_space<vmem>>, vector<16x512xbf16>
    %c0_1 = arith.constant 0 : index
    %c0_2 = arith.constant 0 : index
    %1 = vector.load %arg2[%c0_1, %c0_2] : memref<512x128xbf16, #tpu.memory_space<vmem>>, vector<512x128xbf16>
    %cst = arith.constant dense<0.000000e+00> : vector<16x128xf32>
    %2 = tpu.matmul %0, %1, %cst {dimension_numbers = #tpu.dot_dimension_numbers<[1], [0], [0], [1], [0, 0, 1, 1], [], []>} : vector<16x512xbf16>, vector<512x128xbf16>, vector<16x128xf32> -> vector<16x128xf32>
    %c0_3 = arith.constant 0 : index
    %c0_4 = arith.constant 0 : index
    %3 = vector.load %arg3[%c0_3, %c0_4] : memref<1x128xf32, #tpu.memory_space<vmem>>, vector<1x128xf32>
    %4 = vector.broadcast %3 : vector<1x128xf32> to vector<16x128xf32>
    %5 = arith.addf %2, %4 : vector<16x128xf32>
    %cst_5 = arith.constant 0.000000e+00 : f32
    %6 = vector.broadcast %cst_5 : f32 to vector<16x128xf32>
    %7 = arith.maximumf %5, %6 : vector<16x128xf32>
    %8 = arith.truncf %7 : vector<16x128xf32> to vector<16x128xbf16>
    %c0_6 = arith.constant 0 : index
    %c0_7 = arith.constant 0 : index
    %9 = vector.load %arg4[%c0_6, %c0_7] : memref<128x128xbf16, #tpu.memory_space<vmem>>, vector<128x128xbf16>
    %cst_8 = arith.constant dense<0.000000e+00> : vector<16x128xf32>
    %10 = tpu.matmul %8, %9, %cst_8 {dimension_numbers = #tpu.dot_dimension_numbers<[1], [0], [0], [1], [0, 0, 1, 1], [], []>} : vector<16x128xbf16>, vector<128x128xbf16>, vector<16x128xf32> -> vector<16x128xf32>
    %c0_9 = arith.constant 0 : index
    %c0_10 = arith.constant 0 : index
    %11 = vector.load %arg5[%c0_9, %c0_10] : memref<1x128xf32, #tpu.memory_space<vmem>>, vector<1x128xf32>
    %12 = vector.broadcast %11 : vector<1x128xf32> to vector<16x128xf32>
    %13 = arith.addf %10, %12 : vector<16x128xf32>
    %cst_11 = arith.constant 0.000000e+00 : f32
    %14 = vector.broadcast %cst_11 : f32 to vector<16x128xf32>
    %15 = arith.maximumf %13, %14 : vector<16x128xf32>
    %16 = arith.truncf %15 : vector<16x128xf32> to vector<16x128xbf16>
    %c0_12 = arith.constant 0 : index
    %c0_13 = arith.constant 0 : index
    %17 = vector.load %arg6[%c0_12, %c0_13] : memref<128x128xbf16, #tpu.memory_space<vmem>>, vector<128x128xbf16>
    %cst_14 = arith.constant dense<0.000000e+00> : vector<16x128xf32>
    %18 = tpu.matmul %16, %17, %cst_14 {dimension_numbers = #tpu.dot_dimension_numbers<[1], [0], [0], [1], [0, 0, 1, 1], [], []>} : vector<16x128xbf16>, vector<128x128xbf16>, vector<16x128xf32> -> vector<16x128xf32>
    %c0_15 = arith.constant 0 : index
    %c0_16 = arith.constant 0 : index
    %19 = vector.load %arg7[%c0_15, %c0_16] : memref<1x128xf32, #tpu.memory_space<vmem>>, vector<1x128xf32>
    %20 = vector.broadcast %19 : vector<1x128xf32> to vector<16x128xf32>
    %21 = arith.addf %18, %20 : vector<16x128xf32>
    %c0_17 = arith.constant 0 : index
    %c0_18 = arith.constant 0 : index
    %22 = vector.load %arg8[%c0_17, %c0_18] : memref<16x128xf32, #tpu.memory_space<vmem>>, vector<16x128xf32>
    tpu.vector_store %arg8[%c0_17, %c0_18], %21 {strides = array<i32>} : memref<16x128xf32, #tpu.memory_space<vmem>>, vector<16x128xf32>,
    return
  }
  func.func @transform_0(%arg0: i32) -> (i32, i32) {
    %c0_i32 = arith.constant 0 : i32
    %c0_i32_0 = arith.constant 0 : i32
    return %arg0, %c0_i32 : i32, i32
  }
  func.func @transform_1(%arg0: i32) -> (i32, i32) {
    %c0_i32 = arith.constant 0 : i32
    %c0_i32_0 = arith.constant 0 : i32
    %c0_i32_1 = arith.constant 0 : i32
    return %c0_i32, %c0_i32_0 : i32, i32
  }
  func.func @transform_2(%arg0: i32) -> (i32, i32) {
    %c0_i32 = arith.constant 0 : i32
    %c0_i32_0 = arith.constant 0 : i32
    %c0_i32_1 = arith.constant 0 : i32
    return %c0_i32, %c0_i32_0 : i32, i32
  }
  func.func @transform_3(%arg0: i32) -> (i32, i32) {
    %c0_i32 = arith.constant 0 : i32
    %c0_i32_0 = arith.constant 0 : i32
    %c0_i32_1 = arith.constant 0 : i32
    return %c0_i32, %c0_i32_0 : i32, i32
  }
  func.func @transform_4(%arg0: i32) -> (i32, i32) {
    %c0_i32 = arith.constant 0 : i32
    %c0_i32_0 = arith.constant 0 : i32
    %c0_i32_1 = arith.constant 0 : i32
    return %c0_i32, %c0_i32_0 : i32, i32
  }
  func.func @transform_5(%arg0: i32) -> (i32, i32) {
    %c0_i32 = arith.constant 0 : i32
    %c0_i32_0 = arith.constant 0 : i32
    %c0_i32_1 = arith.constant 0 : i32
    return %c0_i32, %c0_i32_0 : i32, i32
  }
  func.func @transform_6(%arg0: i32) -> (i32, i32) {
    %c0_i32 = arith.constant 0 : i32
    %c0_i32_0 = arith.constant 0 : i32
    %c0_i32_1 = arith.constant 0 : i32
    return %c0_i32, %c0_i32_0 : i32, i32
  }
  func.func @transform_7(%arg0: i32) -> (i32, i32) {
    %c0_i32 = arith.constant 0 : i32
    %c0_i32_0 = arith.constant 0 : i32
    return %arg0, %c0_i32 : i32, i32
  }
}

</mosaic_0001>

<bundles_post_ra>
// kernel: net_forward.3
= control target key start
LH: loop header
LB: loop body
LE: loop exit
PB: predicated region body
PF: predicated region fallthrough
CT: control target
= control target key end

     0   :  { %s2412_s12 = smov 0   ;;  %s2414_s13 = smov 0   ;;  %s2840_s0 = inlined_call_operand.vmem [shape: bf16[4,416,128], index: 0, kind: input, shape index: {}]   ;;  %s2841_s1 = inlined_call_operand.vmem [shape: bf16[128,128], index: 1, kind: input, shape index: {}]   ;;  %s2842_s2 = inlined_call_operand.vmem [shape: f32[1,128], index: 2, kind: input, shape index: {}]   ;;  %s2843_s3 = inlined_call_operand.vmem [shape: bf16[416,128], index: 3, kind: output, shape index: {}]  }
   0x1   :  { %s2416_s14 = smov 0  }
   0x2 LB: > { %s1886_s15 = sadd.s32 4294967295, %s2390_s14   ;;  %s2429_s16 = sadd.s32 1, %s2390_s14   ;;  %s2390_s14 = sphi %s2416_s14, %s2854_s14   ;;  %s2386_s13 = sphi %s2414_s13, %s2853_s13   ;;  %s2382_s12 = sphi %s2412_s12, %s2852_s12  }
   0x3   : > { %s17_s17 = ssub.s32 %s2390_s14, %s2429_s16  ;;  %s20_s18 = sadd.s32 1, %s2386_s13 }
   0x4   : > { %p18_p0 = scmp.eq.s32.totalorder %s17_s17, 0  ;;  %p27_p1 = scmp.ne.s32.totalorder %s2386_s13, %s2382_s12 }
   0x5   : > { %p28_p2 = scmp.eq.s32.totalorder %s2390_s14, 0  ;;  %p1889_p4 = scmp.ge.s32.totalorder %s2390_s14, 2 }
   0x6   : > { %s2438_s19 = scalar_select %p18_p0, %s2386_s13, %s20_s18  }
   0x7   : > { %p29_p3 = por %p28_p2, %p27_p1  ;;  %127 = sbr.rel (%p1889_p4) target bundleno = 45 (0x2d), region = 24 }
   0xe   : > { %130 = sbr.rel (!%p29_p3) target bundleno = 45 (0x2d), region = 28  ;;  %s132_s20 = sand.u32 (%p29_p3), 1, %s2386_s13  }
   0xf   : > { %s1982_s21 = smul.u32 (%p29_p3), 104, %s2390_s14 }
  0x10   : > { %s2282_s22 = smul.u32 (%p29_p3), 416, %s132_s20 }
  0x11   : > { %s2446_s25 = scalar_lea.vmem (%p29_p3), %s2840_s0, %s1982_s21 }
  0x12   : > { %v153_v0 = vld [vmem:[%s2446_s25] sm:$0xff] (%p29_p3)   ;;  %v157_v1 = vld [vmem:[%s2446_s25 + $0x8] sm:$0xff] (%p29_p3)   ;;  %v161_v2 = vld [vmem:[%s2446_s25 + $0x10] sm:$0xff] (%p29_p3)   ;;  %s2451_s26 = scalar_lea.vmem (%p29_p3), [#allocation2], %s2282_s22 }
  0x13   : > { %154 = vst [vmem:[%s2451_s26] sm:$0xff] (%p29_p3), %v153_v0   ;;  %158 = vst [vmem:[%s2451_s26 + $0x8] sm:$0xff] (%p29_p3), %v157_v1   ;;  %v165_v3 = vld [vmem:[%s2446_s25 + $0x18] sm:$0xff] (%p29_p3)   ;;  %v169_v4 = vld [vmem:[%s2446_s25 + $0x20] sm:$0xff] (%p29_p3)  }
  0x14   : > { %162 = vst [vmem:[%s2451_s26 + $0x10] sm:$0xff] (%p29_p3), %v161_v2   ;;  %v173_v5 = vld [vmem:[%s2446_s25 + $0x28] sm:$0xff] (%p29_p3)   ;;  %166 = vst [vmem:[%s2451_s26 + $0x18] sm:$0xff] (%p29_p3), %v165_v3   ;;  %v177_v6 = vld [vmem:[%s2446_s25 + $0x30] sm:$0xff] (%p29_p3)  }
  0x15   : > { %170 = vst [vmem:[%s2451_s26 + $0x20] sm:$0xff] %v169_v4   ;;  %174 = vst [vmem:[%s2451_s26 + $0x28] sm:$0xff] %v173_v5   ;;  %v181_v7 = vld [vmem:[%s2446_s25 + $0x38] sm:$0xff]   ;;  %v185_v8 = vld [vmem:[%s2446_s25 + $0x40] sm:$0xff]  }
  0x16   : > { %178 = vst [vmem:[%s2451_s26 + $0x30] sm:$0xff] %v177_v6   ;;  %182 = vst [vmem:[%s2451_s26 + $0x38] sm:$0xff] %v181_v7   ;;  %v189_v9 = vld [vmem:[%s2446_s25 + $0x48] sm:$0xff]   ;;  %v193_v10 = vld [vmem:[%s2446_s25 + $0x50] sm:$0xff]  }
  0x17   : > { %186 = vst [vmem:[%s2451_s26 + $0x40] sm:$0xff] %v185_v8   ;;  %v197_v11 = vld [vmem:[%s2446_s25 + $0x58] sm:$0xff]   ;;  %190 = vst [vmem:[%s2451_s26 + $0x48] sm:$0xff] %v189_v9   ;;  %v201_v12 = vld [vmem:[%s2446_s25 + $0x60] sm:$0xff]  }
  0x18   : > { %194 = vst [vmem:[%s2451_s26 + $0x50] sm:$0xff] %v193_v10   ;;  %198 = vst [vmem:[%s2451_s26 + $0x58] sm:$0xff] %v197_v11   ;;  %v205_v13 = vld [vmem:[%s2446_s25 + $0xd0] sm:$0xff]   ;;  %v209_v14 = vld [vmem:[%s2446_s25 + $0xd8] sm:$0xff]  }
  0x19   : > { %202 = vst [vmem:[%s2451_s26 + $0x60] sm:$0xff] %v201_v12   ;;  %206 = vst [vmem:[%s2451_s26 + $0x68] sm:$0xff] %v205_v13   ;;  %v213_v15 = vld [vmem:[%s2446_s25 + $0xe0] sm:$0xff]   ;;  %v217_v16 = vld [vmem:[%s2446_s25 + $0xe8] sm:$0xff]  }
  0x1a   : > { %210 = vst [vmem:[%s2451_s26 + $0x70] sm:$0xff] %v209_v14   ;;  %v221_v17 = vld [vmem:[%s2446_s25 + $0xf0] sm:$0xff]   ;;  %214 = vst [vmem:[%s2451_s26 + $0x78] sm:$0xff] %v213_v15   ;;  %v225_v18 = vld [vmem:[%s2446_s25 + $0xf8] sm:$0xff]  }
  0x1b   : > { %218 = vst [vmem:[%s2451_s26 + $0x80] sm:$0xff] %v217_v16   ;;  %222 = vst [vmem:[%s2451_s26 + $0x88] sm:$0xff] %v221_v17   ;;  %v229_v19 = vld [vmem:[%s2446_s25 + $0x100] sm:$0xff]   ;;  %v233_v20 = vld [vmem:[%s2446_s25 + $0x108] sm:$0xff]  }
  0x1c   : > { %226 = vst [vmem:[%s2451_s26 + $0x90] sm:$0xff] %v225_v18   ;;  %230 = vst [vmem:[%s2451_s26 + $0x98] sm:$0xff] %v229_v19   ;;  %v237_v21 = vld [vmem:[%s2446_s25 + $0x110] sm:$0xff]   ;;  %v241_v22 = vld [vmem:[%s2446_s25 + $0x118] sm:$0xff]  }
  0x1d   : > { %234 = vst [vmem:[%s2451_s26 + $0xa0] sm:$0xff] %v233_v20   ;;  %v245_v23 = vld [vmem:[%s2446_s25 + $0x120] sm:$0xff]   ;;  %238 = vst [vmem:[%s2451_s26 + $0xa8] sm:$0xff] %v237_v21   ;;  %v249_v24 = vld [vmem:[%s2446_s25 + $0x128] sm:$0xff]  }
  0x1e   : > { %242 = vst [vmem:[%s2451_s26 + $0xb0] sm:$0xff] %v241_v22   ;;  %246 = vst [vmem:[%s2451_s26 + $0xb8] sm:$0xff] %v245_v23   ;;  %v253_v25 = vld [vmem:[%s2446_s25 + $0x130] sm:$0xff]   ;;  %v257_v26 = vld [vmem:[%s2446_s25 + $0x1a0] sm:$0xff]  }
  0x1f   : > { %250 = vst [vmem:[%s2451_s26 + $0xc0] sm:$0xff] %v249_v24   ;;  %254 = vst [vmem:[%s2451_s26 + $0xc8] sm:$0xff] %v253_v25   ;;  %v261_v27 = vld [vmem:[%s2446_s25 + $0x1a8] sm:$0xff]   ;;  %v265_v28 = vld [vmem:[%s2446_s25 + $0x1b0] sm:$0xff]  }
  0x20   : > { %258 = vst [vmem:[%s2451_s26 + $0xd0] sm:$0xff] %v257_v26   ;;  %v269_v29 = vld [vmem:[%s2446_s25 + $0x1b8] sm:$0xff]   ;;  %262 = vst [vmem:[%s2451_s26 + $0xd8] sm:$0xff] %v261_v27   ;;  %v273_v30 = vld [vmem:[%s2446_s25 + $0x1c0] sm:$0xff]  }
  0x21   : > { %266 = vst [vmem:[%s2451_s26 + $0xe0] sm:$0xff] %v265_v28   ;;  %270 = vst [vmem:[%s2451_s26 + $0xe8] sm:$0xff] %v269_v29   ;;  %v277_v31 = vld [vmem:[%s2446_s25 + $0x1c8] sm:$0xff]   ;;  %v281_v32 = vld [vmem:[%s2446_s25 + $0x1d0] sm:$0xff]  }
  0x22   : > { %274 = vst [vmem:[%s2451_s26 + $0xf0] sm:$0xff] %v273_v30   ;;  %278 = vst [vmem:[%s2451_s26 + $0xf8] sm:$0xff] %v277_v31   ;;  %v285_v33 = vld [vmem:[%s2446_s25 + $0x1d8] sm:$0xff]   ;;  %v289_v34 = vld [vmem:[%s2446_s25 + $0x1e0] sm:$0xff]  }
  0x23   : > { %282 = vst [vmem:[%s2451_s26 + $0x100] sm:$0xff] %v281_v32   ;;  %v293_v35 = vld [vmem:[%s2446_s25 + $0x1e8] sm:$0xff]   ;;  %286 = vst [vmem:[%s2451_s26 + $0x108] sm:$0xff] %v285_v33   ;;  %v297_v36 = vld [vmem:[%s2446_s25 + $0x1f0] sm:$0xff]  }
  0x24   : > { %290 = vst [vmem:[%s2451_s26 + $0x110] sm:$0xff] %v289_v34   ;;  %294 = vst [vmem:[%s2451_s26 + $0x118] sm:$0xff] %v293_v35   ;;  %v301_v37 = vld [vmem:[%s2446_s25 + $0x1f8] sm:$0xff]   ;;  %v305_v38 = vld [vmem:[%s2446_s25 + $0x200] sm:$0xff]  }
  0x25   : > { %298 = vst [vmem:[%s2451_s26 + $0x120] sm:$0xff] %v297_v36   ;;  %302 = vst [vmem:[%s2451_s26 + $0x128] sm:$0xff] %v301_v37   ;;  %v309_v39 = vld [vmem:[%s2446_s25 + $0x270] sm:$0xff]   ;;  %v313_v40 = vld [vmem:[%s2446_s25 + $0x278] sm:$0xff]  }
  0x26   : > { %306 = vst [vmem:[%s2451_s26 + $0x130] sm:$0xff] %v305_v38   ;;  %v317_v41 = vld [vmem:[%s2446_s25 + $0x280] sm:$0xff]   ;;  %310 = vst [vmem:[%s2451_s26 + $0x138] sm:$0xff] %v309_v39   ;;  %v321_v42 = vld [vmem:[%s2446_s25 + $0x288] sm:$0xff]  }
  0x27   : > { %314 = vst [vmem:[%s2451_s26 + $0x140] sm:$0xff] %v313_v40   ;;  %318 = vst [vmem:[%s2451_s26 + $0x148] sm:$0xff] %v317_v41   ;;  %v325_v43 = vld [vmem:[%s2446_s25 + $0x290] sm:$0xff]   ;;  %v329_v44 = vld [vmem:[%s2446_s25 + $0x298] sm:$0xff]  }
  0x28   : > { %322 = vst [vmem:[%s2451_s26 + $0x150] sm:$0xff] %v321_v42   ;;  %326 = vst [vmem:[%s2451_s26 + $0x158] sm:$0xff] %v325_v43   ;;  %v333_v45 = vld [vmem:[%s2446_s25 + $0x2a0] sm:$0xff]   ;;  %v337_v46 = vld [vmem:[%s2446_s25 + $0x2a8] sm:$0xff]  }
  0x29   : > { %330 = vst [vmem:[%s2451_s26 + $0x160] sm:$0xff] %v329_v44   ;;  %v341_v47 = vld [vmem:[%s2446_s25 + $0x2b0] sm:$0xff]   ;;  %334 = vst [vmem:[%s2451_s26 + $0x168] sm:$0xff] %v333_v45   ;;  %v345_v48 = vld [vmem:[%s2446_s25 + $0x2b8] sm:$0xff]  }
  0x2a   : > { %338 = vst [vmem:[%s2451_s26 + $0x170] sm:$0xff] %v337_v46   ;;  %342 = vst [vmem:[%s2451_s26 + $0x178] sm:$0xff] %v341_v47   ;;  %v349_v49 = vld [vmem:[%s2446_s25 + $0x2c0] sm:$0xff]   ;;  %v353_v50 = vld [vmem:[%s2446_s25 + $0x2c8] sm:$0xff]  }
  0x2b   : > { %346 = vst [vmem:[%s2451_s26 + $0x180] sm:$0xff] %v345_v48   ;;  %350 = vst [vmem:[%s2451_s26 + $0x188] sm:$0xff] %v349_v49   ;;  %v357_v51 = vld [vmem:[%s2446_s25 + $0x2d0] sm:$0xff]  }
  0x2c   : > { %354 = vst [vmem:[%s2451_s26 + $0x190] sm:$0xff] %v353_v50   ;;  %358 = vst [vmem:[%s2451_s26 + $0x198] sm:$0xff] %v357_v51  }
  0x2d PF: > { %p1891_p5 = scmp.ge.s32.totalorder %s2390_s14, 1  ;;  %p590_p6 = scmp.lt.s32.totalorder %s2390_s14, 3 }
  0x2f   : > { %p591_p7 = pnand %p1891_p5, %p590_p6 }
  0x31   : > { %594 = sbr.rel (%p591_p7) target bundleno = 413 (0x19d), region = 69 }
  0x38   : > { %v2308_v52 = vld [vmem:[%s2841_s1] sm:$0xff]   ;;  %s597_s29 = sand.u32 1, %s2382_s12   ;;  %v2309_v53 = vld [vmem:[%s2841_s1 + $0x8] sm:$0xff]   ;;  %v2310_v54 = vld [vmem:[%s2841_s1 + $0x10] sm:$0xff]   ;;  %s621_s24 = smul.u32 26, %s1886_s15 }
  0x39   : > { %s2283_s5 = smul.u32 416, %s597_s29  ;;  %2146 = vmatprep.subr.bf16.mxu0 %v2308_v52  ;;  %2266 = vmatprep.subr.bf16.mxu1 %v2308_v52  ;;  %v2311_v55 = vld [vmem:[%s2841_s1 + $0x18] sm:$0xff]   ;;  %v2312_v58 = vld [vmem:[%s2841_s1 + $0x20] sm:$0xff]   ;;  %v2313_v59 = vld [vmem:[%s2841_s1 + $0x28] sm:$0xff]  }
  0x3a   : > { %2147 = vmatpush3.bf16.msra.mxu0 %v2308_v52  ;;  %2274 = vmatpush3.bf16.msra.mxu1 %v2308_v52  ;;  %v2314_v60 = vld [vmem:[%s2841_s1 + $0x30] sm:$0xff]   ;;  %v2315_v61 = vld [vmem:[%s2841_s1 + $0x38] sm:$0xff]   ;;  %p622_p8 = scmp.lt.s32.totalorder %s621_s24, 51 }
  0x3b   : > { %2148 = vmatprep.subr.bf16.mxu0 %v2309_v53  ;;  %2267 = vmatprep.subr.bf16.mxu1 %v2309_v53  ;;  %s2569_s10 = scalar_lea.vmem [#allocation2], %s2283_s5 }
  0x3c   : > { %v2316_v56 = vld [vmem:[%s2569_s10] sm:$0xff]   ;;  %v2318_v57 = vld [vmem:[%s2569_s10 + $0xd0] sm:$0xff]   ;;  %v2317_v62 = vld [vmem:[%s2569_s10 + $0x8] sm:$0xff]   ;;  %s2856_s24 = smov (!%p622_p8, %s621_s24), 51 }
  0x3d   : > { %2162 = vmatprep.mubr.bf16.mxu0 %v2316_v56  ;;  %2214 = vmatprep.mubr.bf16.mxu1 %v2318_v57  ;;  %v2319_v63 = vld [vmem:[%s2569_s10 + $0xd8] sm:$0xff]   ;;  %v2320_v0 = vld [vmem:[%s2569_s10 + $0x10] sm:$0xff]   ;;  %v2322_v1 = vld [vmem:[%s2569_s10 + $0xe0] sm:$0xff]   ;;  %s1892_s14 = sshll.u32 %s2856_s24, 2 }
  0x3e   : > { %2149 = vmatpush3.bf16.msra.mxu0 %v2309_v53  ;;  %2275 = vmatpush3.bf16.msra.mxu1 %v2309_v53  ;;  %v2321_v2 = vld [vmem:[%s2569_s10 + $0x18] sm:$0xff]   ;;  %v2323_v3 = vld [vmem:[%s2569_s10 + $0xe8] sm:$0xff]   ;;  %v2324_v4 = vld [vmem:[%s2569_s10 + $0x20] sm:$0xff]   ;;  %s2747_s28 = scalar_lea.vmem %s2843_s3, %s1892_s14 }
  0x3f   : > { %2150 = vmatprep.subr.bf16.mxu0 %v2310_v54  ;;  %2268 = vmatprep.subr.bf16.mxu1 %v2310_v54  ;;  %v2326_v5 = vld [vmem:[%s2569_s10 + $0xf0] sm:$0xff]   ;;  %v2325_v6 = vld [vmem:[%s2569_s10 + $0x28] sm:$0xff]   ;;  %v2327_v7 = vld [vmem:[%s2569_s10 + $0xf8] sm:$0xff]  }
  0x40   : > { %v2328_v8 = vld [vmem:[%s2569_s10 + $0x30] sm:$0xff]   ;;  %v2330_v9 = vld [vmem:[%s2569_s10 + $0x100] sm:$0xff]   ;;  %v2329_v10 = vld [vmem:[%s2569_s10 + $0x38] sm:$0xff]  }
  0x41   : > { %v2331_v11 = vld [vmem:[%s2569_s10 + $0x108] sm:$0xff]   ;;  %v2332_v12 = vld [vmem:[%s2569_s10 + $0x40] sm:$0xff]   ;;  %v2334_v13 = vld [vmem:[%s2569_s10 + $0x110] sm:$0xff]  }
  0x42   : > { %2151 = vmatpush3.bf16.msra.mxu0 %v2310_v54  ;;  %2276 = vmatpush3.bf16.msra.mxu1 %v2310_v54  ;;  %v2333_v14 = vld [vmem:[%s2569_s10 + $0x48] sm:$0xff]   ;;  %v2335_v15 = vld [vmem:[%s2569_s10 + $0x118] sm:$0xff]   ;;  %v2336_v16 = vld [vmem:[%s2569_s10 + $0x50] sm:$0xff]  }
  0x43   : > { %2152 = vmatprep.subr.bf16.mxu0 %v2311_v55  ;;  %2269 = vmatprep.subr.bf16.mxu1 %v2311_v55  ;;  %v2338_v17 = vld [vmem:[%s2569_s10 + $0x120] sm:$0xff]   ;;  %v2337_v18 = vld [vmem:[%s2569_s10 + $0x58] sm:$0xff]   ;;  %v2339_v19 = vld [vmem:[%s2569_s10 + $0x128] sm:$0xff]  }
  0x44   : > { %v2340_v20 = vld [vmem:[%s2569_s10 + $0x60] sm:$0xff]   ;;  %v2342_v21 = vld [vmem:[%s2569_s10 + $0x130] sm:$0xff]   ;;  %v2341_v22 = vld [vmem:[%s2569_s10 + $0x68] sm:$0xff]  }
  0x45   : > { %v2343_v23 = vld [vmem:[%s2569_s10 + $0x138] sm:$0xff]   ;;  %v2344_v24 = vld [vmem:[%s2569_s10 + $0x70] sm:$0xff]   ;;  %v2346_v25 = vld [vmem:[%s2569_s10 + $0x140] sm:$0xff]  }
  0x46   : > { %2153 = vmatpush3.bf16.msra.mxu0 %v2311_v55  ;;  %2277 = vmatpush3.bf16.msra.mxu1 %v2311_v55  ;;  %v2345_v26 = vld [vmem:[%s2569_s10 + $0x78] sm:$0xff]   ;;  %v2347_v27 = vld [vmem:[%s2569_s10 + $0x148] sm:$0xff]   ;;  %v2348_v28 = vld [vmem:[%s2569_s10 + $0x80] sm:$0xff]  }
  0x47   : > { %2154 = vmatprep.subr.bf16.mxu0 %v2312_v58  ;;  %2270 = vmatprep.subr.bf16.mxu1 %v2312_v58  ;;  %v2350_v29 = vld [vmem:[%s2569_s10 + $0x150] sm:$0xff]   ;;  %v2349_v30 = vld [vmem:[%s2569_s10 + $0x88] sm:$0xff]   ;;  %v2351_v31 = vld [vmem:[%s2569_s10 + $0x158] sm:$0xff]  }
  0x48   : > { %v2352_v32 = vld [vmem:[%s2569_s10 + $0x90] sm:$0xff]   ;;  %v2354_v33 = vld [vmem:[%s2569_s10 + $0x160] sm:$0xff]   ;;  %v2353_v34 = vld [vmem:[%s2569_s10 + $0x98] sm:$0xff]  }
  0x49   : > { %v2355_v35 = vld [vmem:[%s2569_s10 + $0x168] sm:$0xff]   ;;  %v2356_v36 = vld [vmem:[%s2569_s10 + $0xa0] sm:$0xff]   ;;  %v2358_v37 = vld [vmem:[%s2569_s10 + $0x170] sm:$0xff]  }
  0x4a   : > { %2155 = vmatpush3.bf16.msra.mxu0 %v2312_v58  ;;  %2278 = vmatpush3.bf16.msra.mxu1 %v2312_v58  ;;  %v2357_v38 = vld [vmem:[%s2569_s10 + $0xa8] sm:$0xff]   ;;  %v2359_v39 = vld [vmem:[%s2569_s10 + $0x178] sm:$0xff]   ;;  %v2360_v40 = vld [vmem:[%s2569_s10 + $0xb0] sm:$0xff]  }
  0x4b   : > { %2156 = vmatprep.subr.bf16.mxu0 %v2313_v59  ;;  %2271 = vmatprep.subr.bf16.mxu1 %v2313_v59  ;;  %v2362_v41 = vld [vmem:[%s2569_s10 + $0x180] sm:$0xff]   ;;  %v2361_v42 = vld [vmem:[%s2569_s10 + $0xb8] sm:$0xff]   ;;  %v2363_v43 = vld [vmem:[%s2569_s10 + $0x188] sm:$0xff]  }
  0x4c   : > { %v2364_v44 = vld [vmem:[%s2569_s10 + $0xc0] sm:$0xff]   ;;  %v2366_v45 = vld [vmem:[%s2569_s10 + $0x190] sm:$0xff]   ;;  %v2365_v46 = vld [vmem:[%s2569_s10 + $0xc8] sm:$0xff]  }
  0x4d   : > { %v2367_v47 = vld [vmem:[%s2569_s10 + $0x198] sm:$0xff]  }
  0x4e   : > { %2157 = vmatpush3.bf16.msra.mxu0 %v2313_v59  ;;  %2279 = vmatpush3.bf16.msra.mxu1 %v2313_v59 }
  0x4f   : > { %2158 = vmatprep.subr.bf16.mxu0 %v2314_v60  ;;  %2272 = vmatprep.subr.bf16.mxu1 %v2314_v60 }
  0x52   : > { %2159 = vmatpush3.bf16.msra.mxu0 %v2314_v60  ;;  %2280 = vmatpush3.bf16.msra.mxu1 %v2314_v60 }
  0x53   : > { %2160 = vmatprep.subr.bf16.mxu0 %v2315_v61  ;;  %2273 = vmatprep.subr.bf16.mxu1 %v2315_v61 }
  0x56   : > { %2161 = vmatpush3.bf16.msra.mxu0 %v2315_v61  ;;  %2281 = vmatpush3.bf16.msra.mxu1 %v2315_v61 }
  0x59   : > { %2163 = vmatmul.mubr.bf16.vlgmr.msra.gmra.mrb[0].mxu0 %v2317_v62  ;;  %2215 = vmatmul.mubr.bf16.vlgmr.msra.gmra.mrb[0].mxu1 %v2319_v63 }
  0x5a   : > { %2166 = vmatprep.mubr.bf16.mxu0 %v2320_v0  ;;  %2218 = vmatprep.mubr.bf16.mxu1 %v2322_v1 }
  0x61   : > { %2167 = vmatmul.mubr.bf16.gmra.mrb[4].mxu0 %v2321_v2  ;;  %2219 = vmatmul.mubr.bf16.gmra.mrb[4].mxu1 %v2323_v3 }
  0x62   : > { %2170 = vmatprep.mubr.bf16.mxu0 %v2324_v4  ;;  %2222 = vmatprep.mubr.bf16.mxu1 %v2326_v5 }
  0x69   : > { %2171 = vmatmul.mubr.bf16.gmra.mrb[8].mxu0 %v2325_v6  ;;  %2223 = vmatmul.mubr.bf16.gmra.mrb[8].mxu1 %v2327_v7 }
  0x6a   : > { %2174 = vmatprep.mubr.bf16.mxu0 %v2328_v8  ;;  %2226 = vmatprep.mubr.bf16.mxu1 %v2330_v9 }
  0x71   : > { %2175 = vmatmul.mubr.bf16.gmra.mrb[12].mxu0 %v2329_v10  ;;  %2227 = vmatmul.mubr.bf16.gmra.mrb[12].mxu1 %v2331_v11 }
  0x72   : > { %2178 = vmatprep.mubr.bf16.mxu0 %v2332_v12  ;;  %2230 = vmatprep.mubr.bf16.mxu1 %v2334_v13 }
  0x79   : > { %2179 = vmatmul.mubr.bf16.gmra.mrb[16].mxu0 %v2333_v14  ;;  %2231 = vmatmul.mubr.bf16.gmra.mrb[16].mxu1 %v2335_v15 }
  0x7a   : > { %2182 = vmatprep.mubr.bf16.mxu0 %v2336_v16  ;;  %2234 = vmatprep.mubr.bf16.mxu1 %v2338_v17 }
  0x81   : > { %2183 = vmatmul.mubr.bf16.gmra.mrb[20].mxu0 %v2337_v18  ;;  %2235 = vmatmul.mubr.bf16.gmra.mrb[20].mxu1 %v2339_v19 }
  0x82   : > { %2186 = vmatprep.mubr.bf16.mxu0 %v2340_v20  ;;  %2238 = vmatprep.mubr.bf16.mxu1 %v2342_v21 }
  0x89   : > { %2187 = vmatmul.mubr.bf16.gmra.mrb[24].mxu0 %v2341_v22  ;;  %2239 = vmatmul.mubr.bf16.gmra.mrb[24].mxu1 %v2343_v23 }
  0x8a   : > { %2190 = vmatprep.mubr.bf16.mxu0 %v2344_v24  ;;  %2242 = vmatprep.mubr.bf16.mxu1 %v2346_v25 }
  0x91   : > { %2191 = vmatmul.mubr.bf16.gmra.mrb[28].mxu0 %v2345_v26  ;;  %2243 = vmatmul.mubr.bf16.gmra.mrb[28].mxu1 %v2347_v27 }
  0x92   : > { %2194 = vmatprep.mubr.bf16.mxu0 %v2348_v28  ;;  %2246 = vmatprep.mubr.bf16.mxu1 %v2350_v29 }
  0x99   : > { %2195 = vmatmul.mubr.bf16.gmra.mrb[32].mxu0 %v2349_v30  ;;  %2247 = vmatmul.mubr.bf16.gmra.mrb[32].mxu1 %v2351_v31 }
  0x9a   : > { %2198 = vmatprep.mubr.bf16.mxu0 %v2352_v32  ;;  %2250 = vmatprep.mubr.bf16.mxu1 %v2354_v33 }
  0xa1   : > { %2199 = vmatmul.mubr.bf16.gmra.mrb[36].mxu0 %v2353_v34  ;;  %2251 = vmatmul.mubr.bf16.gmra.mrb[36].mxu1 %v2355_v35 }
  0xa2   : > { %2202 = vmatprep.mubr.bf16.mxu0 %v2356_v36  ;;  %2254 = vmatprep.mubr.bf16.mxu1 %v2358_v37 }
  0xa9   : > { %2203 = vmatmul.mubr.bf16.gmra.mrb[40].mxu0 %v2357_v38  ;;  %2255 = vmatmul.mubr.bf16.gmra.mrb[40].mxu1 %v2359_v39 }
  0xaa   : > { %2206 = vmatprep.mubr.bf16.mxu0 %v2360_v40  ;;  %2258 = vmatprep.mubr.bf16.mxu1 %v2362_v41 }
  0xb1   : > { %2207 = vmatmul.mubr.bf16.gmra.mrb[44].mxu0 %v2361_v42  ;;  %2259 = vmatmul.mubr.bf16.gmra.mrb[44].mxu1 %v2363_v43  ;;  %v2736_v43 = vld [vmem:[%s2842_s2] ss:$0 sm:$0xff] }
  0xb2   : > { %2210 = vmatprep.mubr.bf16.mxu0 %v2364_v44  ;;  %2262 = vmatprep.mubr.bf16.mxu1 %v2366_v45 }
  0xb9   : > { %2211 = vmatmul.mubr.bf16.gmra.mrb[48].mxu0 %v2365_v46  ;;  %2263 = vmatmul.mubr.bf16.gmra.mrb[48].mxu1 %v2367_v47 }
 0x12c   : > { %v2635_v48 = vpop.f32.mrb[0].mxu0  ;;  %v2637_v49 = vpop.f32.mrb[0].mxu1 }
 0x12d   : > { %v1142_v50 = vpop.f32.mrb[1].mxu0  ;;  %v1350_v51 = vpop.f32.mrb[1].mxu1 }
 0x12e   : > { %v2639_v52 = vpop.f32.mrb[2].mxu0  ;;  %v2641_v53 = vpop.f32.mrb[2].mxu1 }
 0x12f   : > { %v1145_v54 = vpop.f32.mrb[3].mxu0  ;;  %v1353_v55 = vpop.f32.mrb[3].mxu1 }
 0x134   : > { %v2643_v56 = vpop.f32.mrb[4].mxu0  ;;  %v2645_v57 = vpop.f32.mrb[4].mxu1 }
 0x135   : > { %v2647_v58 = vpop.f32.mrb[5].mxu0  ;;  %v2649_v59 = vpop.f32.mrb[5].mxu1 }
 0x136   : > { %v2651_v60 = vpop.f32.mrb[6].mxu0  ;;  %v2653_v61 = vpop.f32.mrb[6].mxu1 }
 0x137   : > { %v2655_v62 = vpop.f32.mrb[7].mxu0  ;;  %v2657_v63 = vpop.f32.mrb[7].mxu1 }
 0x13c   : > { %v2659_v0 = vpop.f32.mrb[8].mxu0  ;;  %v2661_v1 = vpop.f32.mrb[8].mxu1 }
 0x13d   : > { %v2663_v2 = vpop.f32.mrb[9].mxu0  ;;  %v2665_v3 = vpop.f32.mrb[9].mxu1 }
 0x13e   : > { %v2667_v4 = vpop.f32.mrb[10].mxu0  ;;  %v2669_v5 = vpop.f32.mrb[10].mxu1 }
 0x13f   : > { %v2671_v6 = vpop.f32.mrb[11].mxu0  ;;  %v2673_v7 = vpop.f32.mrb[11].mxu1 }
 0x144   : > { %v2675_v8 = vpop.f32.mrb[12].mxu0  ;;  %v2677_v9 = vpop.f32.mrb[12].mxu1 }
 0x145   : > { %v2679_v10 = vpop.f32.mrb[13].mxu0  ;;  %v2681_v11 = vpop.f32.mrb[13].mxu1 }
 0x146   : > { %v2683_v12 = vpop.f32.mrb[14].mxu0  ;;  %v2685_v13 = vpop.f32.mrb[14].mxu1 }
 0x147   : > { %v2687_v14 = vpop.f32.mrb[15].mxu0  ;;  %v2689_v15 = vpop.f32.mrb[15].mxu1 }
 0x14c   : > { %v2691_v16 = vpop.f32.mrb[16].mxu0  ;;  %v2693_v17 = vpop.f32.mrb[16].mxu1 }
 0x14d   : > { %v2695_v18 = vpop.f32.mrb[17].mxu0  ;;  %v2697_v19 = vpop.f32.mrb[17].mxu1 }
 0x14e   : > { %v2699_v20 = vpop.f32.mrb[18].mxu0  ;;  %v2701_v21 = vpop.f32.mrb[18].mxu1 }
 0x14f   : > { %v2703_v22 = vpop.f32.mrb[19].mxu0  ;;  %v2705_v23 = vpop.f32.mrb[19].mxu1 }
 0x154   : > { %v2707_v24 = vpop.f32.mrb[20].mxu0  ;;  %v2709_v25 = vpop.f32.mrb[20].mxu1 }
 0x155   : > { %2844 = vst [vmem:[#allocation3_spill] sm:$0xff] %v2709_v25  ;;  %v2711_v26 = vpop.f32.mrb[21].mxu0  ;;  %v2713_v27 = vpop.f32.mrb[21].mxu1 }
 0x156   : > { %v2715_v28 = vpop.f32.mrb[22].mxu0  ;;  %v2717_v29 = vpop.f32.mrb[22].mxu1 }
 0x157   : > { %2845 = vst [vmem:[#allocation4_spill] sm:$0xff] %v2715_v28  ;;  %2846 = vst [vmem:[#allocation5_spill] sm:$0xff] %v2717_v29  ;;  %v2719_v30 = vpop.f32.mrb[23].mxu0  ;;  %v2721_v31 = vpop.f32.mrb[23].mxu1 }
 0x15c   : > { %v2188_v32 = vpop.f32.mrb[24].mxu0  ;;  %v2240_v33 = vpop.f32.mrb[24].mxu1 }
 0x15d   : > { %v1557_v34 = vmax.f32 %v1142_v50, %v2188_v32  ;;  %v2725_v35 = vpop.f32.mrb[25].mxu0  ;;  %v2727_v36 = vpop.f32.mrb[25].mxu1 }
 0x15e   : > { %v2189_v37 = vpop.f32.mrb[26].mxu0  ;;  %v2241_v38 = vpop.f32.mrb[26].mxu1 }
 0x15f   : > { %v1558_v39 = vmax.f32 %v1557_v34, %v1350_v51  ;;  %v1560_v40 = vmax.f32 %v1145_v54, %v2189_v37  ;;  %v2729_v41 = vpop.f32.mrb[27].mxu0  ;;  %v2731_v42 = vpop.f32.mrb[27].mxu1 }
 0x160   : > { %2847 = vst [vmem:[#allocation6_spill] sm:$0xff] %v2731_v42 }
 0x161   : > { %v1559_v44 = vmax.f32 %v1558_v39, %v2240_v33  ;;  %v1561_v45 = vmax.f32 %v1560_v40, %v1353_v55 }
 0x163   : > { %v1642_v46 = vadd.f32 %v2736_v43, %v1559_v44  ;;  %v1562_v47 = vmax.f32 %v1561_v45, %v2241_v38 }
 0x164   : > { %v2192_v50 = vpop.f32.mrb[28].mxu0  ;;  %v2244_v32 = vpop.f32.mrb[28].mxu1 }
 0x165   : > { %v1643_v51 = vadd.f32 %v2736_v43, %v1562_v47  ;;  %v1569_v54 = vmax.f32 %v2647_v58, %v2192_v50  ;;  %v1254_v34 = vpop.f32.mrb[29].mxu0  ;;  %v1462_v37 = vpop.f32.mrb[29].mxu1  ;;  %v1668_v25 = vmax.f32 %v1642_v46, 0.0 }
 0x166   : > { %v1563_v29 = vmax.f32 %v2635_v48, %v1254_v34  ;;  %v2193_v42 = vpop.f32.mrb[30].mxu0  ;;  %v2245_v28 = vpop.f32.mrb[30].mxu1 }
 0x167   : > { %v1669_v33 = vmax.f32 %v1643_v51, 0.0  ;;  %v1570_v55 = vmax.f32 %v1569_v54, %v2649_v59  ;;  %v1572_v39 = vmax.f32 %v2655_v62, %v2193_v42  ;;  %v1257_v38 = vpop.f32.mrb[31].mxu0  ;;  %v1465_v40 = vpop.f32.mrb[31].mxu1 }
 0x168   : > { %v1564_v58 = vmax.f32 %v1563_v29, %v2637_v49  ;;  %v1566_v48 = vmax.f32 %v2639_v52, %v1257_v38 }
 0x169   : > { %v2012_v44 = vpack.c.bf16 %v1669_v33, %v1668_v25  ;;  %v1571_v45 = vmax.f32 %v1570_v55, %v2244_v32  ;;  %v1573_v46 = vmax.f32 %v1572_v39, %v2657_v63 }
 0x16a   : > { %v1565_v47 = vmax.f32 %v1564_v58, %v1462_v37  ;;  %v1567_v59 = vmax.f32 %v1566_v48, %v2641_v53 }
 0x16b   : > { %2013 = vst [vmem:[%s2747_s28] sm:$0xff] %v2012_v44   ;;  %v1646_v62 = vadd.f32 %v2736_v43, %v1571_v45  ;;  %v1574_v42 = vmax.f32 %v1573_v46, %v2245_v28 }
 0x16c   : > { %v1644_v50 = vadd.f32 %v2736_v43, %v1565_v47  ;;  %v1568_v51 = vmax.f32 %v1567_v59, %v1465_v40  ;;  %v2196_v54 = vpop.f32.mrb[32].mxu0  ;;  %v2248_v34 = vpop.f32.mrb[32].mxu1 }
 0x16d   : > { %v1647_v49 = vadd.f32 %v2736_v43, %v1574_v42  ;;  %v1581_v52 = vmax.f32 %v2663_v2, %v2196_v54  ;;  %v1270_v25 = vpop.f32.mrb[33].mxu0  ;;  %v1478_v29 = vpop.f32.mrb[33].mxu1  ;;  %v1672_v33 = vmax.f32 %v1646_v62, 0.0 }
 0x16e   : > { %v1645_v63 = vadd.f32 %v2736_v43, %v1568_v51  ;;  %v1575_v32 = vmax.f32 %v2643_v56, %v1270_v25  ;;  %v2197_v53 = vpop.f32.mrb[34].mxu0  ;;  %v2249_v37 = vpop.f32.mrb[34].mxu1  ;;  %v1670_v58 = vmax.f32 %v1644_v50, 0.0 }
 0x16f   : > { %v1673_v28 = vmax.f32 %v1647_v49, 0.0  ;;  %v1582_v55 = vmax.f32 %v1581_v52, %v2665_v3  ;;  %v1584_v39 = vmax.f32 %v2671_v6, %v2197_v53  ;;  %v1273_v38 = vpop.f32.mrb[35].mxu0  ;;  %v1481_v40 = vpop.f32.mrb[35].mxu1 }
 0x170   : > { %v1671_v2 = vmax.f32 %v1645_v63, 0.0  ;;  %v1576_v48 = vmax.f32 %v1575_v32, %v2645_v57  ;;  %v1578_v44 = vmax.f32 %v2651_v60, %v1273_v38 }
 0x171   : > { %v2022_v45 = vpack.c.bf16 %v1673_v28, %v1672_v33  ;;  %v1583_v56 = vmax.f32 %v1582_v55, %v2248_v34  ;;  %v1585_v46 = vmax.f32 %v1584_v39, %v2673_v7 }
 0x172   : > { %v2017_v47 = vpack.c.bf16 %v1671_v2, %v1670_v58  ;;  %v1577_v59 = vmax.f32 %v1576_v48, %v1478_v29  ;;  %v1579_v62 = vmax.f32 %v1578_v44, %v2653_v61 }
 0x173   : > { %2075 = vst [vmem:[%s2747_s28 + $0x10] sm:$0xff] %v2022_v45   ;;  %v1650_v3 = vadd.f32 %v2736_v43, %v1583_v56  ;;  %v1586_v6 = vmax.f32 %v1585_v46, %v2249_v37 }
 0x174   : > { %2074 = vst [vmem:[%s2747_s28 + $0x8] sm:$0xff] %v2017_v47   ;;  %v1648_v42 = vadd.f32 %v2736_v43, %v1577_v59  ;;  %v1580_v50 = vmax.f32 %v1579_v62, %v1481_v40  ;;  %v2200_v51 = vpop.f32.mrb[36].mxu0  ;;  %v2252_v57 = vpop.f32.mrb[36].mxu1 }
 0x175   : > { %v1651_v60 = vadd.f32 %v2736_v43, %v1586_v6  ;;  %v1593_v54 = vmax.f32 %v2679_v10, %v2200_v51  ;;  %v1286_v34 = vpop.f32.mrb[37].mxu0  ;;  %v1494_v7 = vpop.f32.mrb[37].mxu1  ;;  %v1676_v29 = vmax.f32 %v1650_v3, 0.0 }
 0x176   : > { %v1649_v49 = vadd.f32 %v2736_v43, %v1580_v50  ;;  %v1587_v61 = vmax.f32 %v2659_v0, %v1286_v34  ;;  %v2201_v52 = vpop.f32.mrb[38].mxu0  ;;  %v2253_v25 = vpop.f32.mrb[38].mxu1  ;;  %v1674_v28 = vmax.f32 %v1648_v42, 0.0 }
 0x177   : > { %v1677_v63 = vmax.f32 %v1651_v60, 0.0  ;;  %v1594_v32 = vmax.f32 %v1593_v54, %v2681_v11  ;;  %v1596_v53 = vmax.f32 %v2687_v14, %v2201_v52  ;;  %v1289_v37 = vpop.f32.mrb[39].mxu0  ;;  %v1497_v33 = vpop.f32.mrb[39].mxu1 }
 0x178   : > { %v1675_v10 = vmax.f32 %v1649_v49, 0.0  ;;  %v1588_v55 = vmax.f32 %v1587_v61, %v2661_v1  ;;  %v1590_v39 = vmax.f32 %v2667_v4, %v1289_v37 }
 0x179   : > { %v2032_v38 = vpack.c.bf16 %v1677_v63, %v1676_v29  ;;  %v1595_v0 = vmax.f32 %v1594_v32, %v2252_v57  ;;  %v1597_v40 = vmax.f32 %v1596_v53, %v2689_v15 }
 0x17a   : > { %v2027_v58 = vpack.c.bf16 %v1675_v10, %v1674_v28  ;;  %v1589_v2 = vmax.f32 %v1588_v55, %v1494_v7  ;;  %v1591_v48 = vmax.f32 %v1590_v39, %v2669_v5 }
 0x17b   : > { %2077 = vst [vmem:[%s2747_s28 + $0x20] sm:$0xff] %v2032_v38   ;;  %v1654_v11 = vadd.f32 %v2736_v43, %v1595_v0  ;;  %v1598_v14 = vmax.f32 %v1597_v40, %v2253_v25 }
 0x17c   : > { %2076 = vst [vmem:[%s2747_s28 + $0x18] sm:$0xff] %v2027_v58   ;;  %v1652_v44 = vadd.f32 %v2736_v43, %v1589_v2  ;;  %v1592_v45 = vmax.f32 %v1591_v48, %v1497_v33  ;;  %v2204_v56 = vpop.f32.mrb[40].mxu0  ;;  %v2256_v1 = vpop.f32.mrb[40].mxu1 }
 0x17d   : > { %v1655_v4 = vadd.f32 %v2736_v43, %v1598_v14  ;;  %v1605_v46 = vmax.f32 %v2695_v18, %v2204_v56  ;;  %v1302_v47 = vpop.f32.mrb[41].mxu0  ;;  %v1510_v15 = vpop.f32.mrb[41].mxu1  ;;  %v1680_v6 = vmax.f32 %v1654_v11, 0.0 }
 0x17e   : > { %v1653_v59 = vadd.f32 %v2736_v43, %v1592_v45  ;;  %v1599_v5 = vmax.f32 %v2675_v8, %v1302_v47  ;;  %v2205_v62 = vpop.f32.mrb[42].mxu0  ;;  %v2257_v3 = vpop.f32.mrb[42].mxu1  ;;  %v1678_v54 = vmax.f32 %v1652_v44, 0.0 }
 0x17f   : > { %v1681_v42 = vmax.f32 %v1655_v4, 0.0  ;;  %v1606_v50 = vmax.f32 %v1605_v46, %v2697_v19  ;;  %v1608_v51 = vmax.f32 %v2703_v22, %v2205_v62  ;;  %v1305_v57 = vpop.f32.mrb[43].mxu0  ;;  %v1513_v60 = vpop.f32.mrb[43].mxu1 }
 0x180   : > { %v1679_v18 = vmax.f32 %v1653_v59, 0.0  ;;  %v1600_v34 = vmax.f32 %v1599_v5, %v2677_v9  ;;  %v1602_v7 = vmax.f32 %v2683_v12, %v1305_v57 }
 0x181   : > { %v2042_v49 = vpack.c.bf16 %v1681_v42, %v1680_v6  ;;  %v1607_v8 = vmax.f32 %v1606_v50, %v2256_v1  ;;  %v1609_v61 = vmax.f32 %v1608_v51, %v2705_v23 }
 0x182   : > { %v2037_v52 = vpack.c.bf16 %v1679_v18, %v1678_v54  ;;  %v1601_v25 = vmax.f32 %v1600_v34, %v1510_v15  ;;  %v1603_v29 = vmax.f32 %v1602_v7, %v2685_v13  ;;  %v2848_v34 = vld [vmem:[#allocation3_spill] sm:$0xff] }
 0x183   : > { %2079 = vst [vmem:[%s2747_s28 + $0x30] sm:$0xff] %v2042_v49   ;;  %v1658_v19 = vadd.f32 %v2736_v43, %v1607_v8  ;;  %v1610_v22 = vmax.f32 %v1609_v61, %v2257_v3  ;;  %v2849_v49 = vld [vmem:[#allocation4_spill] sm:$0xff] }
 0x184   : > { %2078 = vst [vmem:[%s2747_s28 + $0x28] sm:$0xff] %v2037_v52   ;;  %v1656_v63 = vadd.f32 %v2736_v43, %v1601_v25  ;;  %v1604_v32 = vmax.f32 %v1603_v29, %v1513_v60  ;;  %v2208_v53 = vpop.f32.mrb[44].mxu0  ;;  %v2260_v9 = vpop.f32.mrb[44].mxu1  ;;  %v2850_v52 = vld [vmem:[#allocation6_spill] sm:$0xff] }
 0x185   : > { %v1659_v12 = vadd.f32 %v2736_v43, %v1610_v22  ;;  %v1617_v37 = vmax.f32 %v2711_v26, %v2208_v53  ;;  %v1318_v33 = vpop.f32.mrb[45].mxu0  ;;  %v1526_v23 = vpop.f32.mrb[45].mxu1  ;;  %v1684_v39 = vmax.f32 %v1658_v19, 0.0  ;;  %v2851_v22 = vld [vmem:[#allocation5_spill] sm:$0xff] }
 0x186   : > { %v1657_v28 = vadd.f32 %v2736_v43, %v1604_v32  ;;  %v1611_v13 = vmax.f32 %v2691_v16, %v1318_v33  ;;  %v2209_v10 = vpop.f32.mrb[46].mxu0  ;;  %v2261_v55 = vpop.f32.mrb[46].mxu1  ;;  %v1682_v48 = vmax.f32 %v1656_v63, 0.0 }
 0x187   : > { %v1685_v38 = vmax.f32 %v1659_v12, 0.0  ;;  %v1618_v0 = vmax.f32 %v1617_v37, %v2713_v27  ;;  %v1620_v40 = vmax.f32 %v2719_v30, %v2209_v10  ;;  %v1321_v58 = vpop.f32.mrb[47].mxu0  ;;  %v1529_v2 = vpop.f32.mrb[47].mxu1 }
 0x188   : > { %v1683_v26 = vmax.f32 %v1657_v28, 0.0  ;;  %v1612_v11 = vmax.f32 %v1611_v13, %v2693_v17  ;;  %v1614_v14 = vmax.f32 %v2699_v20, %v1321_v58 }
 0x189   : > { %v2052_v44 = vpack.c.bf16 %v1685_v38, %v1684_v39  ;;  %v1619_v16 = vmax.f32 %v1618_v0, %v2260_v9  ;;  %v1621_v45 = vmax.f32 %v1620_v40, %v2721_v31 }
 0x18a   : > { %v2047_v56 = vpack.c.bf16 %v1683_v26, %v1682_v48  ;;  %v1613_v1 = vmax.f32 %v1612_v11, %v1526_v23  ;;  %v1615_v4 = vmax.f32 %v1614_v14, %v2701_v21 }
 0x18b   : > { %2081 = vst [vmem:[%s2747_s28 + $0x40] sm:$0xff] %v2052_v44   ;;  %v1662_v27 = vadd.f32 %v2736_v43, %v1619_v16  ;;  %v1622_v30 = vmax.f32 %v1621_v45, %v2261_v55 }
 0x18c   : > { %2080 = vst [vmem:[%s2747_s28 + $0x38] sm:$0xff] %v2047_v56   ;;  %v1660_v46 = vadd.f32 %v2736_v43, %v1613_v1  ;;  %v1616_v47 = vmax.f32 %v1615_v4, %v1529_v2  ;;  %v2212_v15 = vpop.f32.mrb[48].mxu0  ;;  %v2264_v17 = vpop.f32.mrb[48].mxu1 }
 0x18d   : > { %v1663_v20 = vadd.f32 %v2736_v43, %v1622_v30  ;;  %v1629_v59 = vmax.f32 %v2725_v35, %v2212_v15  ;;  %v1334_v5 = vpop.f32.mrb[49].mxu0  ;;  %v1542_v31 = vpop.f32.mrb[49].mxu1  ;;  %v1688_v42 = vmax.f32 %v1662_v27, 0.0 }
 0x18e   : > { %v1661_v62 = vadd.f32 %v2736_v43, %v1616_v47  ;;  %v1623_v21 = vmax.f32 %v2707_v24, %v1334_v5  ;;  %v2213_v3 = vpop.f32.mrb[50].mxu0  ;;  %v2265_v6 = vpop.f32.mrb[50].mxu1  ;;  %v1686_v18 = vmax.f32 %v1660_v46, 0.0 }
 0x18f   : > { %v1689_v50 = vmax.f32 %v1663_v20, 0.0  ;;  %v1630_v51 = vmax.f32 %v1629_v59, %v2727_v36  ;;  %v1632_v57 = vmax.f32 %v2729_v41, %v2213_v3  ;;  %v1337_v60 = vpop.f32.mrb[51].mxu0  ;;  %v1545_v54 = vpop.f32.mrb[51].mxu1 }
 0x190   : > { %v1687_v35 = vmax.f32 %v1661_v62, 0.0  ;;  %v1624_v7 = vmax.f32 %v1623_v21, %v2848_v34  ;;  %v1626_v8 = vmax.f32 %v2849_v49, %v1337_v60 }
 0x191   : > { %v2062_v61 = vpack.c.bf16 %v1689_v50, %v1688_v42  ;;  %v1631_v24 = vmax.f32 %v1630_v51, %v2264_v17  ;;  %v1633_v25 = vmax.f32 %v1632_v57, %v2850_v52 }
 0x192   : > { %v2057_v29 = vpack.c.bf16 %v1687_v35, %v1686_v18  ;;  %v1625_v19 = vmax.f32 %v1624_v7, %v1542_v31  ;;  %v1627_v36 = vmax.f32 %v1626_v8, %v2851_v22 }
 0x193   : > { %2083 = vst [vmem:[%s2747_s28 + $0x50] sm:$0xff] %v2062_v61   ;;  %v1666_v41 = vadd.f32 %v2736_v43, %v1631_v24  ;;  %v1634_v63 = vmax.f32 %v1633_v25, %v2265_v6 }
 0x194   : > { %2082 = vst [vmem:[%s2747_s28 + $0x48] sm:$0xff] %v2057_v29   ;;  %v1664_v32 = vadd.f32 %v2736_v43, %v1625_v19  ;;  %v1628_v53 = vmax.f32 %v1627_v36, %v1545_v54 }
 0x195   : > { %v1667_v9 = vadd.f32 %v2736_v43, %v1634_v63  ;;  %v1692_v37 = vmax.f32 %v1666_v41, 0.0 }
 0x196   : > { %v1665_v12 = vadd.f32 %v2736_v43, %v1628_v53  ;;  %v1690_v23 = vmax.f32 %v1664_v32, 0.0 }
 0x197   : > { %v1693_v33 = vmax.f32 %v1667_v9, 0.0 }
 0x198   : > { %v1691_v28 = vmax.f32 %v1665_v12, 0.0 }
 0x199   : > { %v2072_v13 = vpack.c.bf16 %v1693_v33, %v1692_v37 }
 0x19a   : > { %v2067_v10 = vpack.c.bf16 %v1691_v28, %v1690_v23 }
 0x19b   : > { %2085 = vst [vmem:[%s2747_s28 + $0x60] sm:$0xff] %v2072_v13  }
 0x19c   : > { %2084 = vst [vmem:[%s2747_s28 + $0x58] sm:$0xff] %v2067_v10  }
 0x19d PF: > { %p10_p9 = scmp.ge.s32.totalorder %s2429_s16, 4   ;;  %s2852_s12 = smov %s2386_s13 }
 0x19e   : > { %s2853_s13 = smov %s2438_s19  ;;  %s2854_s14 = smov %s2429_s16 }
 0x19f   :  { %12 = sbr.rel (!%p10_p9) target bundleno = 2 (0x2), region = 108 }

// kernel: net_forward.4
= control target key start
LH: loop header
LB: loop body
LE: loop exit
PB: predicated region body
PF: predicated region fallthrough
CT: control target
= control target key end

     0   :  { %s1092_s1 = inlined_call_operand.vmem [shape: bf16[256,128], index: 1, kind: input, shape index: {}]   ;;  %s1093_s0 = inlined_call_operand.vmem [shape: bf16[4,64,256], index: 0, kind: input, shape index: {}]   ;;  %s1094_s2 = inlined_call_operand.vmem [shape: f32[1,128], index: 2, kind: input, shape index: {}]   ;;  %s1095_s3 = inlined_call_operand.vmem [shape: bf16[64,128], index: 3, kind: output, shape index: {}]  }
   0x1   :  { %v803_v0 = vld [vmem:[%s1092_s1 + $0x40] sm:$0xff]   ;;  %v805_v2 = vld [vmem:[%s1092_s1 + $0x48] sm:$0xff]   ;;  %v807_v4 = vld [vmem:[%s1092_s1 + $0x50] sm:$0xff]  }
   0x2   :  { %v804_v1 = vld [vmem:[%s1092_s1] sm:$0xff]   ;;  %675 = vmatprep.subr.bf16.mxu0 %v803_v0  ;;  %787 = vmatprep.subr.bf16.mxu1 %v803_v0  ;;  %v806_v3 = vld [vmem:[%s1092_s1 + $0x8] sm:$0xff]   ;;  %v808_v5 = vld [vmem:[%s1092_s1 + $0x10] sm:$0xff]  }
   0x3   :  { %676 = vmatpush3.bf16.msra.mxu0 %v804_v1  ;;  %795 = vmatpush3.bf16.msra.mxu1 %v804_v1  ;;  %v809_v6 = vld [vmem:[%s1092_s1 + $0x58] sm:$0xff]   ;;  %v811_v8 = vld [vmem:[%s1092_s1 + $0x60] sm:$0xff]   ;;  %v813_v10 = vld [vmem:[%s1092_s1 + $0x68] sm:$0xff]  }
   0x4   :  { %677 = vmatprep.subr.bf16.mxu0 %v805_v2  ;;  %788 = vmatprep.subr.bf16.mxu1 %v805_v2  ;;  %v810_v7 = vld [vmem:[%s1092_s1 + $0x18] sm:$0xff]   ;;  %v812_v9 = vld [vmem:[%s1092_s1 + $0x20] sm:$0xff]   ;;  %v814_v13 = vld [vmem:[%s1092_s1 + $0x28] sm:$0xff]  }
   0x5   :  { %v821_v11 = vld [vmem:[%s1093_s0 + $0x4] ss:$8 sps:$4 sm:$0xff]   ;;  %v815_v14 = vld [vmem:[%s1092_s1 + $0x70] sm:$0xff]   ;;  %v817_v16 = vld [vmem:[%s1092_s1 + $0x78] sm:$0xff]  }
   0x6   :  { %v824_v12 = vld [vmem:[%s1093_s0 + $0x84] ss:$8 sps:$4 sm:$0xff]   ;;  %367 = vmatprep.mubr.bf16.mxu0 %v821_v11  ;;  %v816_v15 = vld [vmem:[%s1092_s1 + $0x30] sm:$0xff]   ;;  %v818_v17 = vld [vmem:[%s1092_s1 + $0x38] sm:$0xff]  }
   0x7   :  { %678 = vmatpush3.bf16.msra.mxu0 %v806_v3  ;;  %796 = vmatpush3.bf16.msra.mxu1 %v806_v3  ;;  %v819_v18 = vld [vmem:[%s1093_s0] ss:$8 sps:$4 sm:$0xff]   ;;  %v825_v20 = vld [vmem:[%s1093_s0 + $0x14] ss:$8 sps:$4 sm:$0xff]   ;;  %v827_v22 = vld [vmem:[%s1093_s0 + $0x10] ss:$8 sps:$4 sm:$0xff]  }
   0x8   :  { %679 = vmatprep.subr.bf16.mxu0 %v807_v4  ;;  %789 = vmatprep.subr.bf16.mxu1 %v807_v4  ;;  %v822_v19 = vld [vmem:[%s1093_s0 + $0x80] ss:$8 sps:$4 sm:$0xff]   ;;  %v828_v21 = vld [vmem:[%s1093_s0 + $0x94] ss:$8 sps:$4 sm:$0xff]   ;;  %v830_v23 = vld [vmem:[%s1093_s0 + $0x90] ss:$8 sps:$4 sm:$0xff]  }
   0x9   :  { %431 = vmatprep.mubr.bf16.mxu1 %v824_v12  ;;  %v831_v24 = vld [vmem:[%s1093_s0 + $0x24] ss:$8 sps:$4 sm:$0xff]   ;;  %v833_v26 = vld [vmem:[%s1093_s0 + $0x20] ss:$8 sps:$4 sm:$0xff]   ;;  %v837_v28 = vld [vmem:[%s1093_s0 + $0x34] ss:$8 sps:$4 sm:$0xff]  }
   0xa   :  { %v834_v25 = vld [vmem:[%s1093_s0 + $0xa4] ss:$8 sps:$4 sm:$0xff]   ;;  %v836_v27 = vld [vmem:[%s1093_s0 + $0xa0] ss:$8 sps:$4 sm:$0xff]   ;;  %v840_v29 = vld [vmem:[%s1093_s0 + $0xb4] ss:$8 sps:$4 sm:$0xff]  }
   0xb   :  { %680 = vmatpush3.bf16.msra.mxu0 %v808_v5  ;;  %797 = vmatpush3.bf16.msra.mxu1 %v808_v5  ;;  %v839_v30 = vld [vmem:[%s1093_s0 + $0x30] ss:$8 sps:$4 sm:$0xff]   ;;  %v843_v32 = vld [vmem:[%s1093_s0 + $0x44] ss:$8 sps:$4 sm:$0xff]   ;;  %v845_v34 = vld [vmem:[%s1093_s0 + $0x40] ss:$8 sps:$4 sm:$0xff]  }
   0xc   :  { %681 = vmatprep.subr.bf16.mxu0 %v809_v6  ;;  %790 = vmatprep.subr.bf16.mxu1 %v809_v6  ;;  %v842_v31 = vld [vmem:[%s1093_s0 + $0xb0] ss:$8 sps:$4 sm:$0xff]   ;;  %v846_v33 = vld [vmem:[%s1093_s0 + $0xc4] ss:$8 sps:$4 sm:$0xff]   ;;  %v848_v35 = vld [vmem:[%s1093_s0 + $0xc0] ss:$8 sps:$4 sm:$0xff]  }
   0xd   :  { %v849_v36 = vld [vmem:[%s1093_s0 + $0x54] ss:$8 sps:$4 sm:$0xff]   ;;  %v851_v38 = vld [vmem:[%s1093_s0 + $0x50] ss:$8 sps:$4 sm:$0xff]   ;;  %v855_v40 = vld [vmem:[%s1093_s0 + $0x64] ss:$8 sps:$4 sm:$0xff]  }
   0xe   :  { %v852_v37 = vld [vmem:[%s1093_s0 + $0xd4] ss:$8 sps:$4 sm:$0xff]   ;;  %v854_v39 = vld [vmem:[%s1093_s0 + $0xd0] ss:$8 sps:$4 sm:$0xff]   ;;  %v858_v41 = vld [vmem:[%s1093_s0 + $0xe4] ss:$8 sps:$4 sm:$0xff]  }
   0xf   :  { %682 = vmatpush3.bf16.msra.mxu0 %v810_v7  ;;  %798 = vmatpush3.bf16.msra.mxu1 %v810_v7  ;;  %v857_v42 = vld [vmem:[%s1093_s0 + $0x60] ss:$8 sps:$4 sm:$0xff]   ;;  %v861_v44 = vld [vmem:[%s1093_s0 + $0x74] ss:$8 sps:$4 sm:$0xff]   ;;  %v863_v46 = vld [vmem:[%s1093_s0 + $0x70] ss:$8 sps:$4 sm:$0xff]  }
  0x10   :  { %683 = vmatprep.subr.bf16.mxu0 %v811_v8  ;;  %791 = vmatprep.subr.bf16.mxu1 %v811_v8  ;;  %v860_v43 = vld [vmem:[%s1093_s0 + $0xe0] ss:$8 sps:$4 sm:$0xff]   ;;  %v864_v45 = vld [vmem:[%s1093_s0 + $0xf4] ss:$8 sps:$4 sm:$0xff]   ;;  %v866_v47 = vld [vmem:[%s1093_s0 + $0xf0] ss:$8 sps:$4 sm:$0xff]  }
  0x13   :  { %684 = vmatpush3.bf16.msra.mxu0 %v812_v9  ;;  %799 = vmatpush3.bf16.msra.mxu1 %v812_v9 }
  0x14   :  { %685 = vmatprep.subr.bf16.mxu0 %v813_v10  ;;  %792 = vmatprep.subr.bf16.mxu1 %v813_v10 }
  0x17   :  { %686 = vmatpush3.bf16.msra.mxu0 %v814_v13  ;;  %800 = vmatpush3.bf16.msra.mxu1 %v814_v13 }
  0x18   :  { %687 = vmatprep.subr.bf16.mxu0 %v815_v14  ;;  %793 = vmatprep.subr.bf16.mxu1 %v815_v14 }
  0x1b   :  { %688 = vmatpush3.bf16.msra.mxu0 %v816_v15  ;;  %801 = vmatpush3.bf16.msra.mxu1 %v816_v15 }
  0x1c   :  { %689 = vmatprep.subr.bf16.mxu0 %v817_v16  ;;  %794 = vmatprep.subr.bf16.mxu1 %v817_v16 }
  0x1f   :  { %690 = vmatpush3.bf16.msra.mxu0 %v818_v17  ;;  %802 = vmatpush3.bf16.msra.mxu1 %v818_v17 }
  0x22   :  { %368 = vmatmul.mubr.bf16.vlgmr.msra.gmra.mrb[0].mxu0 %v819_v18  ;;  %432 = vmatmul.mubr.bf16.vlgmr.msra.gmra.mrb[0].mxu1 %v822_v19 }
  0x23   :  { %375 = vmatprep.mubr.bf16.mxu0 %v825_v20  ;;  %439 = vmatprep.mubr.bf16.mxu1 %v828_v21 }
  0x2a   :  { %376 = vmatmul.mubr.bf16.gmra.mrb[4].mxu0 %v827_v22  ;;  %440 = vmatmul.mubr.bf16.gmra.mrb[4].mxu1 %v830_v23 }
  0x2b   :  { %383 = vmatprep.mubr.bf16.mxu0 %v831_v24  ;;  %447 = vmatprep.mubr.bf16.mxu1 %v834_v25 }
  0x32   :  { %384 = vmatmul.mubr.bf16.gmra.mrb[8].mxu0 %v833_v26  ;;  %448 = vmatmul.mubr.bf16.gmra.mrb[8].mxu1 %v836_v27 }
  0x33   :  { %391 = vmatprep.mubr.bf16.mxu0 %v837_v28  ;;  %455 = vmatprep.mubr.bf16.mxu1 %v840_v29 }
  0x3a   :  { %392 = vmatmul.mubr.bf16.gmra.mrb[12].mxu0 %v839_v30  ;;  %456 = vmatmul.mubr.bf16.gmra.mrb[12].mxu1 %v842_v31 }
  0x3b   :  { %399 = vmatprep.mubr.bf16.mxu0 %v843_v32  ;;  %463 = vmatprep.mubr.bf16.mxu1 %v846_v33 }
  0x42   :  { %400 = vmatmul.mubr.bf16.gmra.mrb[16].mxu0 %v845_v34  ;;  %464 = vmatmul.mubr.bf16.gmra.mrb[16].mxu1 %v848_v35 }
  0x43   :  { %407 = vmatprep.mubr.bf16.mxu0 %v849_v36  ;;  %471 = vmatprep.mubr.bf16.mxu1 %v852_v37 }
  0x4a   :  { %408 = vmatmul.mubr.bf16.gmra.mrb[20].mxu0 %v851_v38  ;;  %472 = vmatmul.mubr.bf16.gmra.mrb[20].mxu1 %v854_v39 }
  0x4b   :  { %415 = vmatprep.mubr.bf16.mxu0 %v855_v40  ;;  %479 = vmatprep.mubr.bf16.mxu1 %v858_v41 }
  0x52   :  { %416 = vmatmul.mubr.bf16.gmra.mrb[24].mxu0 %v857_v42  ;;  %480 = vmatmul.mubr.bf16.gmra.mrb[24].mxu1 %v860_v43 }
  0x53   :  { %423 = vmatprep.mubr.bf16.mxu0 %v861_v44  ;;  %487 = vmatprep.mubr.bf16.mxu1 %v864_v45 }
  0x5a   :  { %424 = vmatmul.mubr.bf16.gmra.mrb[28].mxu0 %v863_v46  ;;  %488 = vmatmul.mubr.bf16.gmra.mrb[28].mxu1 %v866_v47  ;;  %v1058_v47 = vld [vmem:[%s1094_s2] ss:$0 sm:$0xff] }
  0xf5   :  { %v691_v48 = vpop.f32.mrb[0].mxu0  ;;  %v739_v49 = vpop.f32.mrb[0].mxu1 }
  0xf6   :  { %v692_v50 = vpop.f32.mrb[1].mxu0  ;;  %v740_v51 = vpop.f32.mrb[1].mxu1 }
  0xf7   :  { %v693_v52 = vadd.f32 %v692_v50, %v691_v48  ;;  %v694_v53 = vpop.f32.mrb[2].mxu0  ;;  %v741_v54 = vadd.f32 %v740_v51, %v739_v49  ;;  %v742_v55 = vpop.f32.mrb[2].mxu1 }
  0xf8   :  { %v695_v56 = vpop.f32.mrb[3].mxu0  ;;  %v743_v57 = vpop.f32.mrb[3].mxu1 }
  0xf9   :  { %v696_v58 = vadd.f32 %v695_v56, %v694_v53  ;;  %v744_v59 = vadd.f32 %v743_v57, %v742_v55 }
  0xfd   :  { %v697_v60 = vpop.f32.mrb[4].mxu0  ;;  %v745_v61 = vpop.f32.mrb[4].mxu1 }
  0xfe   :  { %v698_v62 = vpop.f32.mrb[5].mxu0  ;;  %v746_v63 = vpop.f32.mrb[5].mxu1 }
  0xff   :  { %v1031_v0 = vadd.f32 %v698_v62, %v697_v60  ;;  %v700_v1 = vpop.f32.mrb[6].mxu0  ;;  %v1033_v2 = vadd.f32 %v746_v63, %v745_v61  ;;  %v748_v3 = vpop.f32.mrb[6].mxu1 }
 0x100   :  { %v701_v4 = vpop.f32.mrb[7].mxu0  ;;  %v749_v5 = vpop.f32.mrb[7].mxu1 }
 0x101   :  { %v1035_v6 = vadd.f32 %v701_v4, %v700_v1  ;;  %v1037_v7 = vadd.f32 %v749_v5, %v748_v3 }
 0x105   :  { %v703_v8 = vpop.f32.mrb[8].mxu0  ;;  %v751_v9 = vpop.f32.mrb[8].mxu1 }
 0x106   :  { %v704_v10 = vpop.f32.mrb[9].mxu0  ;;  %v752_v11 = vpop.f32.mrb[9].mxu1 }
 0x107   :  { %v1039_v12 = vadd.f32 %v704_v10, %v703_v8  ;;  %v706_v13 = vpop.f32.mrb[10].mxu0  ;;  %v1041_v14 = vadd.f32 %v752_v11, %v751_v9  ;;  %v754_v15 = vpop.f32.mrb[10].mxu1 }
 0x108   :  { %v707_v16 = vpop.f32.mrb[11].mxu0  ;;  %v755_v17 = vpop.f32.mrb[11].mxu1 }
 0x109   :  { %v1043_v18 = vadd.f32 %v707_v16, %v706_v13  ;;  %v1045_v19 = vadd.f32 %v755_v17, %v754_v15 }
 0x10d   :  { %v709_v20 = vpop.f32.mrb[12].mxu0  ;;  %v757_v21 = vpop.f32.mrb[12].mxu1 }
 0x10e   :  { %v710_v22 = vpop.f32.mrb[13].mxu0  ;;  %v758_v23 = vpop.f32.mrb[13].mxu1 }
 0x10f   :  { %v1047_v24 = vadd.f32 %v710_v22, %v709_v20  ;;  %v712_v25 = vpop.f32.mrb[14].mxu0  ;;  %v1049_v26 = vadd.f32 %v758_v23, %v757_v21  ;;  %v760_v27 = vpop.f32.mrb[14].mxu1 }
 0x110   :  { %v713_v28 = vpop.f32.mrb[15].mxu0  ;;  %v761_v29 = vpop.f32.mrb[15].mxu1 }
 0x111   :  { %v1051_v30 = vadd.f32 %v713_v28, %v712_v25  ;;  %v1053_v31 = vadd.f32 %v761_v29, %v760_v27 }
 0x115   :  { %v715_v32 = vpop.f32.mrb[16].mxu0  ;;  %v763_v33 = vpop.f32.mrb[16].mxu1 }
 0x116   :  { %v716_v34 = vpop.f32.mrb[17].mxu0  ;;  %v764_v35 = vpop.f32.mrb[17].mxu1 }
 0x117   :  { %v717_v36 = vadd.f32 %v716_v34, %v715_v32  ;;  %v718_v37 = vpop.f32.mrb[18].mxu0  ;;  %v765_v38 = vadd.f32 %v764_v35, %v763_v33  ;;  %v766_v39 = vpop.f32.mrb[18].mxu1 }
 0x118   :  { %v719_v40 = vpop.f32.mrb[19].mxu0  ;;  %v767_v41 = vpop.f32.mrb[19].mxu1 }
 0x119   :  { %v496_v42 = vmax.f32 %v693_v52, %v717_v36  ;;  %v720_v43 = vadd.f32 %v719_v40, %v718_v37  ;;  %v768_v44 = vadd.f32 %v767_v41, %v766_v39 }
 0x11b   :  { %v497_v45 = vmax.f32 %v496_v42, %v741_v54  ;;  %v499_v46 = vmax.f32 %v696_v58, %v720_v43 }
 0x11d   :  { %v498_v48 = vmax.f32 %v497_v45, %v765_v38  ;;  %v500_v49 = vmax.f32 %v499_v46, %v744_v59  ;;  %v721_v50 = vpop.f32.mrb[20].mxu0  ;;  %v769_v51 = vpop.f32.mrb[20].mxu1 }
 0x11e   :  { %v722_v53 = vpop.f32.mrb[21].mxu0  ;;  %v770_v55 = vpop.f32.mrb[21].mxu1 }
 0x11f   :  { %v527_v56 = vadd.f32 %v1058_v47, %v498_v48  ;;  %v501_v57 = vmax.f32 %v500_v49, %v768_v44  ;;  %v723_v60 = vadd.f32 %v722_v53, %v721_v50  ;;  %v724_v52 = vpop.f32.mrb[22].mxu0  ;;  %v771_v61 = vadd.f32 %v770_v55, %v769_v51  ;;  %v772_v62 = vpop.f32.mrb[22].mxu1 }
 0x120   :  { %v725_v54 = vpop.f32.mrb[23].mxu0  ;;  %v773_v58 = vpop.f32.mrb[23].mxu1 }
 0x121   :  { %v528_v63 = vadd.f32 %v1058_v47, %v501_v57  ;;  %v502_v1 = vmax.f32 %v1031_v0, %v723_v60  ;;  %v726_v3 = vadd.f32 %v725_v54, %v724_v52  ;;  %v774_v4 = vadd.f32 %v773_v58, %v772_v62 }
 0x122   :  { %v535_v59 = vmax.f32 %v527_v56, 0.0 }
 0x123   :  { %v536_v5 = vmax.f32 %v528_v63, 0.0  ;;  %v503_v8 = vmax.f32 %v502_v1, %v1033_v2  ;;  %v505_v9 = vmax.f32 %v1035_v6, %v726_v3 }
 0x125   :  { %v655_v10 = vpack.c.bf16 %v536_v5, %v535_v59  ;;  %v504_v11 = vmax.f32 %v503_v8, %v771_v61  ;;  %v506_v13 = vmax.f32 %v505_v9, %v1037_v7  ;;  %v727_v15 = vpop.f32.mrb[24].mxu0  ;;  %v775_v16 = vpop.f32.mrb[24].mxu1 }
 0x126   :  { %v728_v17 = vpop.f32.mrb[25].mxu0  ;;  %v776_v20 = vpop.f32.mrb[25].mxu1 }
 0x127   :  { %656 = vst [vmem:[%s1095_s3] sm:$0xff] %v655_v10   ;;  %v529_v0 = vadd.f32 %v1058_v47, %v504_v11  ;;  %v507_v21 = vmax.f32 %v506_v13, %v774_v4  ;;  %v729_v22 = vadd.f32 %v728_v17, %v727_v15  ;;  %v730_v23 = vpop.f32.mrb[26].mxu0  ;;  %v777_v2 = vadd.f32 %v776_v20, %v775_v16  ;;  %v778_v25 = vpop.f32.mrb[26].mxu1 }
 0x128   :  { %v731_v6 = vpop.f32.mrb[27].mxu0  ;;  %v779_v27 = vpop.f32.mrb[27].mxu1 }
 0x129   :  { %v530_v28 = vadd.f32 %v1058_v47, %v507_v21  ;;  %v508_v7 = vmax.f32 %v1039_v12, %v729_v22  ;;  %v732_v29 = vadd.f32 %v731_v6, %v730_v23  ;;  %v780_v32 = vadd.f32 %v779_v27, %v778_v25 }
 0x12a   :  { %v537_v33 = vmax.f32 %v529_v0, 0.0 }
 0x12b   :  { %v538_v34 = vmax.f32 %v530_v28, 0.0  ;;  %v509_v35 = vmax.f32 %v508_v7, %v1041_v14  ;;  %v511_v36 = vmax.f32 %v1043_v18, %v732_v29 }
 0x12d   :  { %v660_v37 = vpack.c.bf16 %v538_v34, %v537_v33  ;;  %v510_v38 = vmax.f32 %v509_v35, %v777_v2  ;;  %v512_v39 = vmax.f32 %v511_v36, %v1045_v19  ;;  %v733_v40 = vpop.f32.mrb[28].mxu0  ;;  %v781_v41 = vpop.f32.mrb[28].mxu1 }
 0x12e   :  { %v734_v42 = vpop.f32.mrb[29].mxu0  ;;  %v782_v43 = vpop.f32.mrb[29].mxu1 }
 0x12f   :  { %672 = vst [vmem:[%s1095_s3 + $0x8] sm:$0xff] %v660_v37   ;;  %v531_v12 = vadd.f32 %v1058_v47, %v510_v38  ;;  %v513_v44 = vmax.f32 %v512_v39, %v780_v32  ;;  %v735_v45 = vadd.f32 %v734_v42, %v733_v40  ;;  %v736_v46 = vpop.f32.mrb[30].mxu0  ;;  %v783_v14 = vadd.f32 %v782_v43, %v781_v41  ;;  %v784_v48 = vpop.f32.mrb[30].mxu1 }
 0x130   :  { %v737_v18 = vpop.f32.mrb[31].mxu0  ;;  %v785_v49 = vpop.f32.mrb[31].mxu1 }
 0x131   :  { %v532_v50 = vadd.f32 %v1058_v47, %v513_v44  ;;  %v514_v19 = vmax.f32 %v1047_v24, %v735_v45  ;;  %v738_v51 = vadd.f32 %v737_v18, %v736_v46  ;;  %v786_v53 = vadd.f32 %v785_v49, %v784_v48 }
 0x132   :  { %v539_v55 = vmax.f32 %v531_v12, 0.0 }
 0x133   :  { %v540_v56 = vmax.f32 %v532_v50, 0.0  ;;  %v515_v57 = vmax.f32 %v514_v19, %v1049_v26  ;;  %v517_v60 = vmax.f32 %v1051_v30, %v738_v51 }
 0x135   :  { %v665_v52 = vpack.c.bf16 %v540_v56, %v539_v55  ;;  %v516_v61 = vmax.f32 %v515_v57, %v783_v14  ;;  %v518_v62 = vmax.f32 %v517_v60, %v1053_v31 }
 0x137   :  { %673 = vst [vmem:[%s1095_s3 + $0x10] sm:$0xff] %v665_v52   ;;  %v533_v54 = vadd.f32 %v1058_v47, %v516_v61  ;;  %v519_v58 = vmax.f32 %v518_v62, %v786_v53 }
 0x139   :  { %v534_v24 = vadd.f32 %v1058_v47, %v519_v58  ;;  %v541_v63 = vmax.f32 %v533_v54, 0.0 }
 0x13b   :  { %v542_v1 = vmax.f32 %v534_v24, 0.0 }
 0x13d   :  { %v670_v3 = vpack.c.bf16 %v542_v1, %v541_v63 }
 0x13f   :  { %674 = vst [vmem:[%s1095_s3 + $0x18] sm:$0xff] %v670_v3  }

// kernel: net_forward.5
= control target key start
LH: loop header
LB: loop body
LE: loop exit
PB: predicated region body
PF: predicated region fallthrough
CT: control target
= control target key end

     0   :  { %v845_v34 = vmov 0.0   ;;  %vm846_vm0 = vmmov 0   ;;  %s1076_s1 = inlined_call_operand.vmem [shape: bf16[512,128], index: 1, kind: input, shape index: {}]   ;;  %s1077_s0 = inlined_call_operand.vmem [shape: bf16[16,512], index: 0, kind: input, shape index: {}]   ;;  %s1078_s3 = inlined_call_operand.vmem [shape: bf16[128,128], index: 3, kind: input, shape index: {}]   ;;  %s1079_s5 = inlined_call_operand.vmem [shape: bf16[128,128], index: 5, kind: input, shape index: {}]   ;;  %s1080_s2 = inlined_call_operand.vmem [shape: f32[1,128], index: 2, kind: input, shape index: {}]   ;;  %s1081_s4 = inlined_call_operand.vmem [shape: f32[1,128], index: 4, kind: input, shape index: {}]   ;;  %s1082_s6 = inlined_call_operand.vmem [shape: f32[1,128], index: 6, kind: input, shape index: {}]   ;;  %s1083_s7 = inlined_call_operand.vmem [shape: f32[16,128], index: 7, kind: output, shape index: {}]  }
   0x1   :  { %v791_v0 = vld [vmem:[%s1076_s1 + $0x40] sm:$0xff]   ;;  %v795_v4 = vld [vmem:[%s1076_s1 + $0x48] sm:$0xff]   ;;  %v799_v8 = vld [vmem:[%s1076_s1 + $0x50] sm:$0xff]  }
   0x2   :  { %v792_v1 = vld [vmem:[%s1076_s1 + $0xc0] sm:$0xff]   ;;  %687 = vmatprep.subr.bf16.mxu0 %v791_v0  ;;  %v796_v5 = vld [vmem:[%s1076_s1 + $0xc8] sm:$0xff]   ;;  %v800_v9 = vld [vmem:[%s1076_s1 + $0xd0] sm:$0xff]  }
   0x3   :  { %v793_v2 = vld [vmem:[%s1076_s1] sm:$0xff]   ;;  %709 = vmatprep.subr.bf16.mxu1 %v792_v1  ;;  %v797_v6 = vld [vmem:[%s1076_s1 + $0x8] sm:$0xff]   ;;  %v801_v10 = vld [vmem:[%s1076_s1 + $0x10] sm:$0xff]  }
   0x4   :  { %v794_v3 = vld [vmem:[%s1076_s1 + $0x80] sm:$0xff]   ;;  %688 = vmatpush3.bf16.msra.mxu0 %v793_v2  ;;  %v798_v7 = vld [vmem:[%s1076_s1 + $0x88] sm:$0xff]   ;;  %v802_v11 = vld [vmem:[%s1076_s1 + $0x90] sm:$0xff]  }
   0x5   :  { %710 = vmatpush3.bf16.msra.mxu1 %v794_v3  ;;  %689 = vmatprep.subr.bf16.mxu0 %v795_v4  ;;  %v803_v12 = vld [vmem:[%s1076_s1 + $0x58] sm:$0xff]   ;;  %v807_v16 = vld [vmem:[%s1076_s1 + $0x60] sm:$0xff]   ;;  %v811_v20 = vld [vmem:[%s1076_s1 + $0x68] sm:$0xff]  }
   0x6   :  { %711 = vmatprep.subr.bf16.mxu1 %v796_v5  ;;  %v804_v13 = vld [vmem:[%s1076_s1 + $0xd8] sm:$0xff]   ;;  %v808_v17 = vld [vmem:[%s1076_s1 + $0xe0] sm:$0xff]   ;;  %v812_v21 = vld [vmem:[%s1076_s1 + $0xe8] sm:$0xff]  }
   0x7   :  { %v805_v14 = vld [vmem:[%s1076_s1 + $0x18] sm:$0xff]   ;;  %v809_v18 = vld [vmem:[%s1076_s1 + $0x20] sm:$0xff]   ;;  %v813_v22 = vld [vmem:[%s1076_s1 + $0x28] sm:$0xff]  }
   0x8   :  { %690 = vmatpush3.bf16.msra.mxu0 %v797_v6  ;;  %v806_v15 = vld [vmem:[%s1076_s1 + $0x98] sm:$0xff]   ;;  %v810_v19 = vld [vmem:[%s1076_s1 + $0xa0] sm:$0xff]   ;;  %v814_v23 = vld [vmem:[%s1076_s1 + $0xa8] sm:$0xff]  }
   0x9   :  { %712 = vmatpush3.bf16.msra.mxu1 %v798_v7  ;;  %691 = vmatprep.subr.bf16.mxu0 %v799_v8  ;;  %v815_v24 = vld [vmem:[%s1076_s1 + $0x70] sm:$0xff]   ;;  %v819_v28 = vld [vmem:[%s1076_s1 + $0x78] sm:$0xff]   ;;  %v829_v37 = vld [vmem:[%s1078_s3] sm:$0xff]  }
   0xa   :  { %713 = vmatprep.subr.bf16.mxu1 %v800_v9  ;;  %v816_v25 = vld [vmem:[%s1076_s1 + $0xf0] sm:$0xff]   ;;  %v820_v29 = vld [vmem:[%s1076_s1 + $0xf8] sm:$0xff]   ;;  %v830_v38 = vld [vmem:[%s1078_s3 + $0x8] sm:$0xff]  }
   0xb   :  { %v817_v26 = vld [vmem:[%s1076_s1 + $0x30] sm:$0xff]   ;;  %v821_v30 = vld [vmem:[%s1076_s1 + $0x38] sm:$0xff]   ;;  %v833_v41 = vld [vmem:[%s1078_s3 + $0x20] sm:$0xff]  }
   0xc   :  { %692 = vmatpush3.bf16.msra.mxu0 %v801_v10  ;;  %v818_v27 = vld [vmem:[%s1076_s1 + $0xb0] sm:$0xff]   ;;  %v822_v31 = vld [vmem:[%s1076_s1 + $0xb8] sm:$0xff]   ;;  %v834_v42 = vld [vmem:[%s1078_s3 + $0x28] sm:$0xff]  }
   0xd   :  { %714 = vmatpush3.bf16.msra.mxu1 %v802_v11  ;;  %693 = vmatprep.subr.bf16.mxu0 %v803_v12  ;;  %v823_v32 = vld [vmem:[%s1077_s0] ss:$16 sps:$4 sm:$0xff]   ;;  %v825_v33 = vld [vmem:[%s1077_s0 + $0x4] ss:$16 sps:$4 sm:$0xff]   ;;  %v826_v35 = vld [vmem:[%s1077_s0 + $0x8] ss:$16 sps:$4 sm:$0xff]  }
   0xe   :  { %715 = vmatprep.subr.bf16.mxu1 %v804_v13  ;;  %v828_v36 = vld [vmem:[%s1077_s0 + $0xc] ss:$16 sps:$4 sm:$0xff]   ;;  %346 = vmatprep.mubr.bf16.mxu0 %v825_v33  ;;  %v831_v39 = vld [vmem:[%s1078_s3 + $0x10] sm:$0xff]   ;;  %v837_v45 = vld [vmem:[%s1079_s5] sm:$0xff]  }
   0xf   :  { %387 = vmatprep.mubr.bf16.mxu1 %v828_v36  ;;  %v832_v40 = vld [vmem:[%s1078_s3 + $0x18] sm:$0xff]   ;;  %v835_v43 = vld [vmem:[%s1078_s3 + $0x30] sm:$0xff]   ;;  %v838_v46 = vld [vmem:[%s1079_s5 + $0x8] sm:$0xff]  }
  0x10   :  { %694 = vmatpush3.bf16.msra.mxu0 %v805_v14  ;;  %v836_v44 = vld [vmem:[%s1078_s3 + $0x38] sm:$0xff]   ;;  %v839_v47 = vld [vmem:[%s1079_s5 + $0x10] sm:$0xff]   ;;  %v841_v49 = vld [vmem:[%s1079_s5 + $0x20] sm:$0xff]  }
  0x11   :  { %716 = vmatpush3.bf16.msra.mxu1 %v806_v15  ;;  %695 = vmatprep.subr.bf16.mxu0 %v807_v16  ;;  %v840_v48 = vld [vmem:[%s1079_s5 + $0x18] sm:$0xff]   ;;  %v842_v50 = vld [vmem:[%s1079_s5 + $0x28] sm:$0xff]   ;;  %v632_v53 = vld [vmem:[%s1080_s2] ss:$0 sm:$0xff] }
  0x12   :  { %717 = vmatprep.subr.bf16.mxu1 %v808_v17  ;;  %v843_v7 = vld [vmem:[%s1079_s5 + $0x30] sm:$0xff]   ;;  %v844_v8 = vld [vmem:[%s1079_s5 + $0x38] sm:$0xff]   ;;  %v669_v9 = vld [vmem:[%s1081_s4] ss:$0 sm:$0xff] }
  0x14   :  { %696 = vmatpush3.bf16.msra.mxu0 %v809_v18 }
  0x15   :  { %718 = vmatpush3.bf16.msra.mxu1 %v810_v19  ;;  %697 = vmatprep.subr.bf16.mxu0 %v811_v20  ;;  %v678_v19 = vld [vmem:[%s1082_s6] ss:$0 sm:$0xff] }
  0x16   :  { %719 = vmatprep.subr.bf16.mxu1 %v812_v21 }
  0x18   :  { %698 = vmatpush3.bf16.msra.mxu0 %v813_v22 }
  0x19   :  { %720 = vmatpush3.bf16.msra.mxu1 %v814_v23  ;;  %699 = vmatprep.subr.bf16.mxu0 %v815_v24 }
  0x1a   :  { %721 = vmatprep.subr.bf16.mxu1 %v816_v25 }
  0x1c   :  { %700 = vmatpush3.bf16.msra.mxu0 %v817_v26 }
  0x1d   :  { %722 = vmatpush3.bf16.msra.mxu1 %v818_v27  ;;  %701 = vmatprep.subr.bf16.mxu0 %v819_v28 }
  0x1e   :  { %723 = vmatprep.subr.bf16.mxu1 %v820_v29 }
  0x20   :  { %702 = vmatpush3.bf16.msra.mxu0 %v821_v30 }
  0x21   :  { %724 = vmatpush3.bf16.msra.mxu1 %v822_v31  ;;  %749 = vmatprep.subr.bf16.mxu0 %v845_v34 }
  0x22   :  { %769 = vmatprep.subr.bf16.mxu1 %v845_v34 }
  0x23   :  { %347 = vmatmul.mubr.bf16.vlgmr.msra.gmra.mrb[0].mxu0 %v823_v32 }
  0x24   :  { %388 = vmatmul.mubr.bf16.vlgmr.msra.gmra.mrb[0].mxu1 %v826_v35  ;;  %750 = vmatpush3.bf16.msra.mxu0 %v829_v37 }
  0x25   :  { %751 = vmatprep.subr.bf16.mxu0 %v845_v34  ;;  %765 = vmatprep.mubr.msk.bf16.mxu0 %vm846_vm0, %v845_v34 }
  0x26   :  { %785 = vmatprep.mubr.msk.bf16.mxu1 %vm846_vm0, %v845_v34  ;;  %770 = vmatpush3.bf16.msra.mxu1 %v837_v45 }
  0x27   :  { %771 = vmatprep.subr.bf16.mxu1 %v845_v34 }
  0x28   :  { %752 = vmatpush3.bf16.msra.mxu0 %v830_v38 }
  0x29   :  { %753 = vmatprep.subr.bf16.mxu0 %v845_v34 }
  0x2a   :  { %772 = vmatpush3.bf16.msra.mxu1 %v838_v46 }
  0x2b   :  { %773 = vmatprep.subr.bf16.mxu1 %v845_v34 }
  0x2c   :  { %754 = vmatpush3.bf16.msra.mxu0 %v831_v39 }
  0x2d   :  { %755 = vmatprep.subr.bf16.mxu0 %v845_v34 }
  0x2e   :  { %774 = vmatpush3.bf16.msra.mxu1 %v839_v47 }
  0x2f   :  { %775 = vmatprep.subr.bf16.mxu1 %v845_v34 }
  0x30   :  { %756 = vmatpush3.bf16.msra.mxu0 %v832_v40 }
  0x31   :  { %757 = vmatprep.subr.bf16.mxu0 %v845_v34 }
  0x32   :  { %776 = vmatpush3.bf16.msra.mxu1 %v840_v48 }
  0x33   :  { %777 = vmatprep.subr.bf16.mxu1 %v845_v34 }
  0x34   :  { %758 = vmatpush3.bf16.msra.mxu0 %v833_v41 }
  0x35   :  { %759 = vmatprep.subr.bf16.mxu0 %v845_v34 }
  0x36   :  { %778 = vmatpush3.bf16.msra.mxu1 %v841_v49 }
  0x37   :  { %779 = vmatprep.subr.bf16.mxu1 %v845_v34 }
  0x38   :  { %760 = vmatpush3.bf16.msra.mxu0 %v834_v42 }
  0x39   :  { %761 = vmatprep.subr.bf16.mxu0 %v845_v34 }
  0x3a   :  { %780 = vmatpush3.bf16.msra.mxu1 %v842_v50 }
  0x3b   :  { %781 = vmatprep.subr.bf16.mxu1 %v845_v34 }
  0x3c   :  { %762 = vmatpush3.bf16.msra.mxu0 %v835_v43 }
  0x3d   :  { %763 = vmatprep.subr.bf16.mxu0 %v845_v34 }
  0x3e   :  { %782 = vmatpush3.bf16.msra.mxu1 %v843_v7 }
  0x3f   :  { %783 = vmatprep.subr.bf16.mxu1 %v845_v34 }
  0x40   :  { %764 = vmatpush3.bf16.msra.mxu0 %v836_v44 }
  0x42   :  { %784 = vmatpush3.bf16.msra.mxu1 %v844_v8 }
  0xf6   :  { %v703_v51 = vpop.f32.mrb[0].mxu0 }
  0xf7   :  { %v725_v52 = vpop.f32.mrb[0].mxu1  ;;  %v704_v54 = vpop.f32.mrb[1].mxu0 }
  0xf8   :  { %v705_v55 = vadd.f32 %v704_v54, %v703_v51  ;;  %v726_v56 = vpop.f32.mrb[1].mxu1  ;;  %v706_v57 = vpop.f32.mrb[2].mxu0 }
  0xf9   :  { %v727_v58 = vadd.f32 %v726_v56, %v725_v52  ;;  %v728_v59 = vpop.f32.mrb[2].mxu1  ;;  %v707_v60 = vpop.f32.mrb[3].mxu0 }
  0xfa   :  { %v349_v61 = vadd.f32 %v705_v55, %v632_v53  ;;  %v708_v62 = vadd.f32 %v707_v60, %v706_v57  ;;  %v729_v63 = vpop.f32.mrb[3].mxu1 }
  0xfb   :  { %v730_v0 = vadd.f32 %v729_v63, %v728_v59 }
  0xfc   :  { %v390_v1 = vadd.f32 %v727_v58, %v349_v61  ;;  %v352_v2 = vadd.f32 %v708_v62, %v632_v53 }
  0xfe   :  { %v393_v3 = vadd.f32 %v730_v0, %v352_v2  ;;  %v396_v4 = vmax.f32 %v390_v1, 0.0 }
 0x100   :  { %v397_v5 = vmax.f32 %v393_v3, 0.0 }
 0x102   :  { %v398_v6 = vpack.c.bf16 %v397_v5, %v396_v4 }
 0x104   :  { %766 = vmatmul.mubr.bf16.vlgmr.msra.gmra.mrb[4].mxu0 %v398_v6 }
 0x1d7   :  { %v504_v10 = vpop.f32.mrb[4].mxu0 }
 0x1d8   :  { %v505_v11 = vadd.f32 %v669_v9, %v504_v10  ;;  %v767_v12 = vpop.f32.mrb[5].mxu0 }
 0x1d9   :  { %v507_v13 = vpop.f32.mrb[6].mxu0 }
 0x1da   :  { %v508_v14 = vadd.f32 %v669_v9, %v507_v13  ;;  %v768_v15 = vpop.f32.mrb[7].mxu0  ;;  %v511_v16 = vmax.f32 %v505_v11, 0.0 }
 0x1dc   :  { %v512_v17 = vmax.f32 %v508_v14, 0.0 }
 0x1de   :  { %v513_v18 = vpack.c.bf16 %v512_v17, %v511_v16 }
 0x1e0   :  { %786 = vmatmul.mubr.bf16.vlgmr.msra.gmra.mrb[4].mxu1 %v513_v18 }
 0x2b3   :  { %v619_v20 = vpop.f32.mrb[4].mxu1 }
 0x2b4   :  { %v620_v21 = vadd.f32 %v678_v19, %v619_v20  ;;  %v787_v22 = vpop.f32.mrb[5].mxu1 }
 0x2b5   :  { %v622_v23 = vpop.f32.mrb[6].mxu1 }
 0x2b6   :  { %626 = vst [vmem:[%s1083_s7] sm:$0xff] %v620_v21  ;;  %v623_v24 = vadd.f32 %v678_v19, %v622_v23  ;;  %v788_v25 = vpop.f32.mrb[7].mxu1 }
 0x2b8   :  { %627 = vst [vmem:[%s1083_s7 + $0x8] sm:$0xff] %v623_v24 }

</bundles_post_ra>
